<compile_context>
chip_gen: v7x
topology: tpu7x:2x2x1
jax: 0.10.0
libtpu: 0.0.40
codegen_flags: <defaults>
</compile_context>

<pallas_src>
import functools
import math

import jax
import jax.numpy as jnp
from jax import lax
from jax.experimental import pallas as pl
from jax.experimental.pallas import tpu as pltpu


def _round_up(v, m):
    return (v + m - 1) // m * m


# ----------------------------------------------------------------------------
# Fused kernel:  grid = (layer, adj-column-strip)
#   layer 0:  acc = adj @ (X @ W1)          -> h = relu(acc + b1)
#   layer 1:  acc = adj @ (h @ W2)          -> log_softmax(acc + b2)
# ----------------------------------------------------------------------------
def gcn_fused_kernel(x_ref, w1_ref, b1_ref, w2_ref, b2_ref, adj_ref,
                     out_ref, sup_ref, acc_ref, *, tk, nclass):
    layer = pl.program_id(0)            # 0: gc1, 1: gc2  (sequential)
    k = pl.program_id(1)                # adj column-strip index (reduction)
    nk = pl.num_programs(1)

    # --- phase init (once, before the first adj strip of layer 0) -----------
    @pl.when(jnp.logical_and(layer == 0, k == 0))
    def _():
        # support1 = X @ W1  -- computed ONCE, kept resident for all k strips.
        sup_ref[...] = jnp.dot(x_ref[...], w1_ref[...],
                               preferred_element_type=jnp.float32)
        acc_ref[...] = jnp.zeros_like(acc_ref)

    # --- accumulate one adj column strip (both layers) ----------------------
    row0 = pl.multiple_of(k * tk, tk)
    acc_ref[...] += jnp.dot(adj_ref[...], sup_ref[pl.ds(row0, tk), :],
                            preferred_element_type=jnp.float32)

    # --- layer-0 finalize: h = relu(acc + b1); support2 = h @ W2 ------------
    @pl.when(jnp.logical_and(layer == 0, k == nk - 1))
    def _():
        h = jnp.maximum(acc_ref[...] + b1_ref[...], 0.0)
        # TODO(synk): training-mode dropout (pltpu.prng_random_bits mask) not
        # wired in; F.dropout with training=False is the identity.
        sup_ref[...] = jnp.dot(h, w2_ref[...],
                               preferred_element_type=jnp.float32)
        acc_ref[...] = jnp.zeros_like(acc_ref)

    # --- layer-1 finalize: bias -> masked log_softmax -> single write -------
    @pl.when(jnp.logical_and(layer == 1, k == nk - 1))
    def _():
        logits = acc_ref[...] + b2_ref[...]
        col = lax.broadcasted_iota(jnp.int32, logits.shape, 1)
        logits = jnp.where(col < nclass, logits, -1e30)   # kill padded classes
        m = jnp.max(logits, axis=1, keepdims=True)
        shifted = logits - m
        lse = jnp.log(jnp.sum(jnp.exp(shifted), axis=1, keepdims=True))
        out_ref[...] = (shifted - lse).astype(out_ref.dtype)


# ----------------------------------------------------------------------------
# Wrapper
# ----------------------------------------------------------------------------
def gcn_forward(x, adj, params, dropout_p=0.5, training=False, *, tk=128):
    del dropout_p, training   # inference: dropout is identity (see kernel TODO)

    n, nfeat = x.shape
    w1, b1, w2, b2 = params["w1"], params["b1"], params["w2"], params["b2"]
    nhid, nclass = w1.shape[1], w2.shape[1]
    assert adj.shape == (n, n)
    assert n % 8 == 0, "N must be a multiple of 8 (sublane tiling)"

    # Lane-dense padded width for the hidden / class axes (feedback item).
    fpad = max(_round_up(nhid, 128), _round_up(nclass, 128))
    w1p = jnp.zeros((nfeat, fpad), jnp.float32).at[:, :nhid].set(w1)
    b1p = jnp.zeros((1, fpad), jnp.float32).at[:, :nhid].set(b1.reshape(1, -1))
    w2p = jnp.zeros((fpad, fpad), jnp.float32).at[:nhid, :nclass].set(w2)
    b2p = jnp.zeros((1, fpad), jnp.float32).at[:, :nclass].set(b2.reshape(1, -1))

    # adjacency column-strip (reduction) tile; fall back to full dim if needed.
    if n % tk != 0:
        tk = n
    nk = n // tk

    kernel = functools.partial(gcn_fused_kernel, tk=tk, nclass=nclass)

    # Rough VMEM footprint (double-buffered blocks + scratch), with headroom,
    # bounded so the request is safe on v7x's 64 MiB VMEM.
    f32 = 4
    est = (2 * n * tk                      # adj strip (double-buffered)
           + 2 * n * nfeat                 # x block
           + 2 * (nfeat * fpad + fpad * fpad + 2 * fpad)   # weights / biases
           + 2 * n * fpad                  # output block
           + 2 * n * fpad) * f32           # scratch (support + accumulator)
    vmem_limit = int(min(max(2 * est, 32 * 1024 * 1024), 60 * 1024 * 1024))

    cost = pl.CostEstimate(
        flops=2 * n * nfeat * fpad + 2 * n * fpad * fpad + 4 * n * n * fpad,
        transcendentals=n * fpad,
        bytes_accessed=f32 * (n * nfeat + nfeat * fpad + fpad * fpad
                              + 2 * fpad + 2 * n * n + n * fpad),
    )

    out_pad = pl.pallas_call(
        kernel,
        out_shape=jax.ShapeDtypeStruct((n, fpad), jnp.float32),
        grid_spec=pltpu.PrefetchScalarGridSpec(
            num_scalar_prefetch=0,
            grid=(2, nk),                                   # (layer, adj strip)
            in_specs=[
                pl.BlockSpec((n, nfeat), lambda l, k: (0, 0)),    # x (resident)
                pl.BlockSpec((nfeat, fpad), lambda l, k: (0, 0)),  # W1 (padded)
                pl.BlockSpec((1, fpad), lambda l, k: (0, 0)),      # b1 (padded)
                pl.BlockSpec((fpad, fpad), lambda l, k: (0, 0)),   # W2 (padded)
                pl.BlockSpec((1, fpad), lambda l, k: (0, 0)),      # b2 (padded)
                pl.BlockSpec((n, tk), lambda l, k: (0, k)),        # adj strip
            ],
            out_specs=pl.BlockSpec((n, fpad), lambda l, k: (0, 0)),
            scratch_shapes=[
                pltpu.VMEM((n, fpad), jnp.float32),   # support (X@W1 then h@W2)
                pltpu.VMEM((n, fpad), jnp.float32),   # adj-matmul accumulator
            ],
        ),
        compiler_params=pltpu.CompilerParams(
            dimension_semantics=("arbitrary", "arbitrary"),
            vmem_limit_bytes=vmem_limit,
        ),
        cost_estimate=cost,
    )(x, w1p, b1p, w2p, b2p, adj)

    return out_pad[:, :nclass]


# ----------------------------------------------------------------------------
# Deterministic parameter init (mirrors GraphConvolution.reset_parameters:
# uniform(-1/sqrt(out_features), 1/sqrt(out_features)) for W and b)
# ----------------------------------------------------------------------------
def init_params(key, nfeat, nhid, nclass):
    k1, k2, k3, k4 = jax.random.split(key, 4)
    s1 = 1.0 / math.sqrt(nhid)
    s2 = 1.0 / math.sqrt(nclass)
    return {
        "w1": jax.random.uniform(k1, (nfeat, nhid), jnp.float32, -s1, s1),
        "b1": jax.random.uniform(k2, (1, nhid), jnp.float32, -s1, s1),
        "w2": jax.random.uniform(k3, (nhid, nclass), jnp.float32, -s2, s2),
        "b2": jax.random.uniform(k4, (1, nclass), jnp.float32, -s2, s2),
    }


# ----------------------------------------------------------------------------
# Main
# ----------------------------------------------------------------------------
if __name__ == "__main__":
    key = jax.random.PRNGKey(0)
    k_x, k_adj, k_p = jax.random.split(key, 3)

    # Small shapes consistent with pygcn (nhid=16, nclass=7); N chosen so the
    # adj-strip grid actually has >1 reduction step (256 / 128 = 2 strips).
    N, NFEAT, NHID, NCLASS = 256, 128, 16, 7

    # Node features.
    x = jax.random.normal(k_x, (N, NFEAT), jnp.float32)

    # Symmetric, self-looped, row-normalized dense adjacency.
    a = (jax.random.uniform(k_adj, (N, N)) < 0.05).astype(jnp.float32)
    a = jnp.maximum(a, a.T) + jnp.eye(N, dtype=jnp.float32)
    adj = a / jnp.sum(a, axis=1, keepdims=True)

    params = init_params(k_p, NFEAT, NHID, NCLASS)

    out = gcn_forward(x, adj, params, dropout_p=0.5, training=False)
    out = jax.block_until_ready(out)

    # Pure-JAX reference (high-precision matmuls) for correctness.
    hp = jax.lax.Precision.HIGHEST
    h_ref = jnp.maximum(
        jnp.dot(adj, jnp.dot(x, params["w1"], precision=hp), precision=hp)
        + params["b1"], 0.0)
    logits_ref = (jnp.dot(adj, jnp.dot(h_ref, params["w2"], precision=hp),
                          precision=hp) + params["b2"])
    ref = jax.nn.log_softmax(logits_ref, axis=1)

    assert out.shape == (N, NCLASS)
    row_sums = jnp.sum(jnp.exp(out), axis=1)
    assert bool(jnp.all(jnp.abs(row_sums - 1.0) < 1e-4))
    assert bool(jnp.allclose(out, ref, atol=1e-3, rtol=1e-3))

    print("KERNEL_OK")
</pallas_src>

<mosaic_0001>
module attributes {stable_mosaic.version = 11 : i64} {
  func.func @gcn_fused_kernel(%arg0: i32, %arg1: i32, %arg2: memref<256x128xf32, #tpu.memory_space<vmem>>, %arg3: memref<128x128xf32, #tpu.memory_space<vmem>>, %arg4: memref<1x128xf32, #tpu.memory_space<vmem>>, %arg5: memref<128x128xf32, #tpu.memory_space<vmem>>, %arg6: memref<1x128xf32, #tpu.memory_space<vmem>>, %arg7: memref<256x128xf32, #tpu.memory_space<vmem>>, %arg8: memref<256x128xf32, #tpu.memory_space<vmem>>, %arg9: memref<256x128xf32, #tpu.memory_space<vmem>>, %arg10: memref<256x128xf32, #tpu.memory_space<vmem>>) attributes {dimension_semantics = [#tpu.dimension_semantics<arbitrary>, #tpu.dimension_semantics<arbitrary>], iteration_bounds = array<i64: 2, 2>, scalar_prefetch = 0 : i64, scratch_operands = 2 : i64, tpu.core_type = #tpu.core_type<tc>, window_params = [{pipeline_mode = #tpu.pipeline_mode<synchronous>, transform_indices = @transform_0, window_bounds = array<i64: 256, 128>}, {pipeline_mode = #tpu.pipeline_mode<synchronous>, transform_indices = @transform_1, window_bounds = array<i64: 128, 128>}, {pipeline_mode = #tpu.pipeline_mode<synchronous>, transform_indices = @transform_2, window_bounds = array<i64: 1, 128>}, {pipeline_mode = #tpu.pipeline_mode<synchronous>, transform_indices = @transform_3, window_bounds = array<i64: 128, 128>}, {pipeline_mode = #tpu.pipeline_mode<synchronous>, transform_indices = @transform_4, window_bounds = array<i64: 1, 128>}, {transform_indices = @transform_5, window_bounds = array<i64: 256, 128>}, {pipeline_mode = #tpu.pipeline_mode<synchronous>, transform_indices = @transform_6, window_bounds = array<i64: 256, 128>}]} {
    %c0_i32 = arith.constant 0 : i32
    %0 = arith.cmpi eq, %arg0, %c0_i32 : i32
    %c0_i32_0 = arith.constant 0 : i32
    %1 = arith.cmpi eq, %arg1, %c0_i32_0 : i32
    %2 = arith.andi %0, %1 : i1
    %3 = arith.extui %2 : i1 to i32
    %c0_i32_1 = arith.constant 0 : i32
    %4 = arith.cmpi ne, %3, %c0_i32_1 : i32
    scf.if %4 {
      %c0_13 = arith.constant 0 : index
      %c0_14 = arith.constant 0 : index
      %24 = vector.load %arg2[%c0_13, %c0_14] : memref<256x128xf32, #tpu.memory_space<vmem>>, vector<256x128xf32>
      %c0_15 = arith.constant 0 : index
      %c0_16 = arith.constant 0 : index
      %25 = vector.load %arg3[%c0_15, %c0_16] : memref<128x128xf32, #tpu.memory_space<vmem>>, vector<128x128xf32>
      %cst_17 = arith.constant dense<0.000000e+00> : vector<256x128xf32>
      %26 = tpu.matmul %24, %25, %cst_17 {dimension_numbers = #tpu.dot_dimension_numbers<[1], [0], [0], [1], [0, 0, 1, 1], [], []>} : vector<256x128xf32>, vector<128x128xf32>, vector<256x128xf32> -> vector<256x128xf32>
      %c0_18 = arith.constant 0 : index
      %c0_19 = arith.constant 0 : index
      %27 = vector.load %arg9[%c0_18, %c0_19] : memref<256x128xf32, #tpu.memory_space<vmem>>, vector<256x128xf32>
      tpu.vector_store %arg9[%c0_18, %c0_19], %26 {strides = array<i32>} : memref<256x128xf32, #tpu.memory_space<vmem>>, vector<256x128xf32>,
      %cst_20 = arith.constant 0.000000e+00 : f32
      %28 = vector.broadcast %cst_20 : f32 to vector<256x128xf32>
      %c0_21 = arith.constant 0 : index
      %c0_22 = arith.constant 0 : index
      %29 = vector.load %arg10[%c0_21, %c0_22] : memref<256x128xf32, #tpu.memory_space<vmem>>, vector<256x128xf32>
      tpu.vector_store %arg10[%c0_21, %c0_22], %28 {strides = array<i32>} : memref<256x128xf32, #tpu.memory_space<vmem>>, vector<256x128xf32>,
    } else {
    }
    %c128_i32 = arith.constant 128 : i32
    %5 = arith.muli %arg1, %c128_i32 : i32
    %6 = tpu.assume_multiple %5, 128 : i32
    %c0 = arith.constant 0 : index
    %c0_2 = arith.constant 0 : index
    %7 = vector.load %arg10[%c0, %c0_2] : memref<256x128xf32, #tpu.memory_space<vmem>>, vector<256x128xf32>
    %c0_3 = arith.constant 0 : index
    %c0_4 = arith.constant 0 : index
    %8 = vector.load %arg7[%c0_3, %c0_4] : memref<256x128xf32, #tpu.memory_space<vmem>>, vector<256x128xf32>
    %9 = arith.index_cast %6 : i32 to index
    %c0_5 = arith.constant 0 : index
    %10 = vector.load %arg9[%9, %c0_5] : memref<256x128xf32, #tpu.memory_space<vmem>>, vector<128x128xf32>
    %cst = arith.constant dense<0.000000e+00> : vector<256x128xf32>
    %11 = tpu.matmul %8, %10, %cst {dimension_numbers = #tpu.dot_dimension_numbers<[1], [0], [0], [1], [0, 0, 1, 1], [], []>} : vector<256x128xf32>, vector<128x128xf32>, vector<256x128xf32> -> vector<256x128xf32>
    %12 = arith.addf %7, %11 : vector<256x128xf32>
    %c0_6 = arith.constant 0 : index
    %c0_7 = arith.constant 0 : index
    %13 = vector.load %arg10[%c0_6, %c0_7] : memref<256x128xf32, #tpu.memory_space<vmem>>, vector<256x128xf32>
    tpu.vector_store %arg10[%c0_6, %c0_7], %12 {strides = array<i32>} : memref<256x128xf32, #tpu.memory_space<vmem>>, vector<256x128xf32>,
    %c0_i32_8 = arith.constant 0 : i32
    %14 = arith.cmpi eq, %arg0, %c0_i32_8 : i32
    %c1_i32 = arith.constant 1 : i32
    %15 = arith.cmpi eq, %arg1, %c1_i32 : i32
    %16 = arith.andi %14, %15 : i1
    %17 = arith.extui %16 : i1 to i32
    %c0_i32_9 = arith.constant 0 : i32
    %18 = arith.cmpi ne, %17, %c0_i32_9 : i32
    scf.if %18 {
      %c0_13 = arith.constant 0 : index
      %c0_14 = arith.constant 0 : index
      %24 = vector.load %arg10[%c0_13, %c0_14] : memref<256x128xf32, #tpu.memory_space<vmem>>, vector<256x128xf32>
      %c0_15 = arith.constant 0 : index
      %c0_16 = arith.constant 0 : index
      %25 = vector.load %arg4[%c0_15, %c0_16] : memref<1x128xf32, #tpu.memory_space<vmem>>, vector<1x128xf32>
      %26 = vector.broadcast %25 : vector<1x128xf32> to vector<256x128xf32>
      %27 = arith.addf %24, %26 : vector<256x128xf32>
      %cst_17 = arith.constant 0.000000e+00 : f32
      %28 = vector.broadcast %cst_17 : f32 to vector<256x128xf32>
      %29 = arith.maximumf %27, %28 : vector<256x128xf32>
      %c0_18 = arith.constant 0 : index
      %c0_19 = arith.constant 0 : index
      %30 = vector.load %arg5[%c0_18, %c0_19] : memref<128x128xf32, #tpu.memory_space<vmem>>, vector<128x128xf32>
      %cst_20 = arith.constant dense<0.000000e+00> : vector<256x128xf32>
      %31 = tpu.matmul %29, %30, %cst_20 {dimension_numbers = #tpu.dot_dimension_numbers<[1], [0], [0], [1], [0, 0, 1, 1], [], []>} : vector<256x128xf32>, vector<128x128xf32>, vector<256x128xf32> -> vector<256x128xf32>
      %c0_21 = arith.constant 0 : index
      %c0_22 = arith.constant 0 : index
      %32 = vector.load %arg9[%c0_21, %c0_22] : memref<256x128xf32, #tpu.memory_space<vmem>>, vector<256x128xf32>
      tpu.vector_store %arg9[%c0_21, %c0_22], %31 {strides = array<i32>} : memref<256x128xf32, #tpu.memory_space<vmem>>, vector<256x128xf32>,
      %cst_23 = arith.constant 0.000000e+00 : f32
      %33 = vector.broadcast %cst_23 : f32 to vector<256x128xf32>
      %c0_24 = arith.constant 0 : index
      %c0_25 = arith.constant 0 : index
      %34 = vector.load %arg10[%c0_24, %c0_25] : memref<256x128xf32, #tpu.memory_space<vmem>>, vector<256x128xf32>
      tpu.vector_store %arg10[%c0_24, %c0_25], %33 {strides = array<i32>} : memref<256x128xf32, #tpu.memory_space<vmem>>, vector<256x128xf32>,
    } else {
    }
    %c1_i32_10 = arith.constant 1 : i32
    %19 = arith.cmpi eq, %arg0, %c1_i32_10 : i32
    %c1_i32_11 = arith.constant 1 : i32
    %20 = arith.cmpi eq, %arg1, %c1_i32_11 : i32
    %21 = arith.andi %19, %20 : i1
    %22 = arith.extui %21 : i1 to i32
    %c0_i32_12 = arith.constant 0 : i32
    %23 = arith.cmpi ne, %22, %c0_i32_12 : i32
    scf.if %23 {
      %c0_13 = arith.constant 0 : index
      %c0_14 = arith.constant 0 : index
      %24 = vector.load %arg10[%c0_13, %c0_14] : memref<256x128xf32, #tpu.memory_space<vmem>>, vector<256x128xf32>
      %c0_15 = arith.constant 0 : index
      %c0_16 = arith.constant 0 : index
      %25 = vector.load %arg6[%c0_15, %c0_16] : memref<1x128xf32, #tpu.memory_space<vmem>>, vector<1x128xf32>
      %26 = vector.broadcast %25 : vector<1x128xf32> to vector<256x128xf32>
      %27 = arith.addf %24, %26 : vector<256x128xf32>
      %28 = tpu.iota {dimensions = array<i32: 1>} : vector<256x128xi32>
      %c7_i32 = arith.constant 7 : i32
      %29 = vector.broadcast %c7_i32 : i32 to vector<256x128xi32>
      %30 = arith.cmpi slt, %28, %29 : vector<256x128xi32>
      %cst_17 = arith.constant -1.000000e+30 : f32
      %31 = vector.broadcast %cst_17 : f32 to vector<256x128xf32>
      %32 = arith.select %30, %27, %31 : vector<256x128xi1>, vector<256x128xf32>
      %cst_18 = arith.constant dense<0xFF800000> : vector<256xf32>
      %33 = vector.multi_reduction <maximumf>, %32, %cst_18 [1] : vector<256x128xf32> to vector<256xf32>
      %34 = vector.shape_cast %33 : vector<256xf32> to vector<256x1xf32>
      %35 = vector.broadcast %34 : vector<256x1xf32> to vector<256x128xf32>
      %36 = arith.subf %32, %35 : vector<256x128xf32>
      %37 = math.exp %36 : vector<256x128xf32>
      %cst_19 = arith.constant dense<0.000000e+00> : vector<256xf32>
      %38 = vector.multi_reduction <add>, %37, %cst_19 [1] : vector<256x128xf32> to vector<256xf32>
      %39 = vector.shape_cast %38 : vector<256xf32> to vector<256x1xf32>
      %40 = math.log %39 : vector<256x1xf32>
      %41 = vector.broadcast %40 : vector<256x1xf32> to vector<256x128xf32>
      %42 = arith.subf %36, %41 : vector<256x128xf32>
      %c0_20 = arith.constant 0 : index
      %c0_21 = arith.constant 0 : index
      %43 = vector.load %arg8[%c0_20, %c0_21] : memref<256x128xf32, #tpu.memory_space<vmem>>, vector<256x128xf32>
      tpu.vector_store %arg8[%c0_20, %c0_21], %42 {strides = array<i32>} : memref<256x128xf32, #tpu.memory_space<vmem>>, vector<256x128xf32>,
    } else {
    }
    return
  }
  func.func @transform_0(%arg0: i32, %arg1: i32) -> (i32, i32) {
    %c0_i32 = arith.constant 0 : i32
    %c0_i32_0 = arith.constant 0 : i32
    %c0_i32_1 = arith.constant 0 : i32
    return %c0_i32, %c0_i32_0 : i32, i32
  }
  func.func @transform_1(%arg0: i32, %arg1: i32) -> (i32, i32) {
    %c0_i32 = arith.constant 0 : i32
    %c0_i32_0 = arith.constant 0 : i32
    %c0_i32_1 = arith.constant 0 : i32
    return %c0_i32, %c0_i32_0 : i32, i32
  }
  func.func @transform_2(%arg0: i32, %arg1: i32) -> (i32, i32) {
    %c0_i32 = arith.constant 0 : i32
    %c0_i32_0 = arith.constant 0 : i32
    %c0_i32_1 = arith.constant 0 : i32
    return %c0_i32, %c0_i32_0 : i32, i32
  }
  func.func @transform_3(%arg0: i32, %arg1: i32) -> (i32, i32) {
    %c0_i32 = arith.constant 0 : i32
    %c0_i32_0 = arith.constant 0 : i32
    %c0_i32_1 = arith.constant 0 : i32
    return %c0_i32, %c0_i32_0 : i32, i32
  }
  func.func @transform_4(%arg0: i32, %arg1: i32) -> (i32, i32) {
    %c0_i32 = arith.constant 0 : i32
    %c0_i32_0 = arith.constant 0 : i32
    %c0_i32_1 = arith.constant 0 : i32
    return %c0_i32, %c0_i32_0 : i32, i32
  }
  func.func @transform_5(%arg0: i32, %arg1: i32) -> (i32, i32) {
    %c0_i32 = arith.constant 0 : i32
    %c0_i32_0 = arith.constant 0 : i32
    return %c0_i32, %arg1 : i32, i32
  }
  func.func @transform_6(%arg0: i32, %arg1: i32) -> (i32, i32) {
    %c0_i32 = arith.constant 0 : i32
    %c0_i32_0 = arith.constant 0 : i32
    %c0_i32_1 = arith.constant 0 : i32
    return %c0_i32, %c0_i32_0 : i32, i32
  }
}

</mosaic_0001>

<bundles_post_ra>
// kernel: tpu_custom_call.1
= control target key start
LH: loop header
LB: loop body
LE: loop exit
PB: predicated region body
PF: predicated region fallthrough
CT: control target
= control target key end

     0   :  { %s3918_s0 = inlined_call_operand.hbm [shape: f32[256,128], index: 0, kind: input, shape index: {}]   ;;  %s3919_s1 = inlined_call_operand.hbm [shape: f32[128,128], index: 1, kind: input, shape index: {}]   ;;  %s3920_s2 = inlined_call_operand.vmem [shape: f32[1,128], index: 2, kind: input, shape index: {}]   ;;  %s3921_s3 = inlined_call_operand.hbm [shape: f32[128,128], index: 3, kind: input, shape index: {}]   ;;  %s3922_s4 = inlined_call_operand.vmem [shape: f32[1,128], index: 4, kind: input, shape index: {}]   ;;  %s3923_s5 = inlined_call_operand.hbm [shape: f32[256,256], index: 5, kind: input, shape index: {}]   ;;  %s3924_s6 = inlined_call_operand.hbm [shape: f32[256,128], index: 6, kind: output, shape index: {}]  }
   0x1   :  { %3934 = sst [smem:[#allocation19_spill]] %s3920_s2 }
   0x2   :  { %3935 = sst [smem:[#allocation20_spill]] %s3922_s4 }
   0x3   :  { %3936 = sst [smem:[#allocation21_spill]] %s3924_s6 }
   0x4   :  { %11 = vsyncpa [#allocation5], 0 }
   0x5   :  { %12 = vsyncpa [#allocation8], 0 }
   0x6   :  { %13 = vsyncpa [#allocation11], 0 }
   0x7   :  { %15 = vsyncpa [#allocation11 + $0x1], 0 }
   0x8   :  { %16 = vsyncpa [#allocation6], 0  ;;  %s3066_s21 = smov 0   ;;  %s3068_s22 = smov 0  }
   0x9   :  { %s3070_s23 = smov 0   ;;  %s3072_s24 = smov 0  }
   0xa   :  { %s3074_s25 = smov 0   ;;  %s3076_s26 = smov 0  }
   0xb   :  { %s3078_s27 = smov 0   ;;  %s3080_s28 = smov 0  }
   0xc LB: > { %3937 = sst [smem:[#allocation17_spill]] %s3001_s24  ;;  %s3930_s29 = sadd.s32 4294967295, %s3017_s28   ;;  %s3017_s28 = sphi %s3080_s28, %s3967_s28   ;;  %s3013_s27 = sphi %s3078_s27, %s3966_s27   ;;  %s3009_s26 = sphi %s3076_s26, %s3965_s26   ;;  %s3005_s25 = sphi %s3074_s25, %s3964_s25   ;;  %s3001_s24 = sphi %s3072_s24, %s3963_s24   ;;  %s2997_s23 = sphi %s3070_s23, %s3962_s23   ;;  %s2993_s22 = sphi %s3068_s22, %s3961_s22   ;;  %s2989_s21 = sphi %s3066_s21, %s3960_s21  }
   0xd   : > { %3938 = sst [smem:[#allocation18_spill]] %s3017_s28  ;;  %p153_p0 = scmp.ne.s32.totalorder %s2997_s23, %s2993_s22 }
   0xe   : > { %p154_p1 = scmp.eq.s32.totalorder %s3017_s28, 0  ;;  %p159_p2 = scmp.ne.s32.totalorder %s2993_s22, %s2989_s21 }
   0xf   : > { %p3111_p3 = scmp.eq.s32.totalorder %s3930_s29, 0  ;;  %p2008_p4 = scmp.ge.s32.totalorder %s3017_s28, 1 }
  0x10   : > { %p155_p5 = por %p154_p1, %p153_p0  ;;  %p191_p6 = scmp.lt.s32.totalorder %s3017_s28, 5 }
  0x11   : > { %s3939_s30 = scalar_select %p3111_p3, 1, 0 }
  0x12   : > { %p3119_p7 = por %p3111_p3, %p159_p2  ;;  %p3123_p8 = pnand %p2008_p4, %p191_p6 }
  0x13   : > { %s3019_s9 = smov [#allocation7]   ;;  %p2590_p11 = scmp.lt.s32.totalorder %s3017_s28, 4 }
  0x14   : > { %s3940_s7 = scalar_select %p3119_p7, 1, 0 }
  0x15   : > { %s3941_s8 = scalar_select %p3123_p8, 1, 0 }
  0x16   : > { %p2573_p9 = pneg %p3123_p8  ;;  %s216_s10 = sshll.u32 %s3019_s9, 4  ;;  %s217_s10 = int_to_ptr.vmem [resolvable:$true] %s216_s10 }
  0x17   : > { %p3136_p12 = pnand %p2590_p11, %p155_p5  ;;  %s2799_s15 = scalar_lea.hbm %s3919_s1, 2048 }
  0x18   : > { %p3131_p10 = pnand %p2573_p9, %p3111_p3  ;;  %p2800_p13 = scmp.ne.s32.totalorder %s3919_s1, %s2799_s15 }
  0x19   : > { %s3943_s12 = scalar_select %p3136_p12, 1, 0 }
  0x1a   : > { %p3148_p0 = pneg %p3131_p10  ;;  %p2806_p4 = scmp.lt.u32.totalorder %s2799_s15, %s3919_s1 }
  0x1c   : > { %p2802_p1 = pnand %p3148_p0, %p2800_p13 }
  0x1e   : > { %p2803_p2 = pneg %p2802_p1 }
  0x20   : > { %p2808_p5 = pnand %p2806_p4, %p2803_p2 }
  0x22   : > { %2811 = shalt.err (!%p2808_p5)
}
  0x23   : > { %s2812_s21 = scalar_lea.vmem %s217_s10, 2048  ;;  %p2820_p7 = scmp.lt.s32.totalorder %s217_s10, %s217_s10 }
  0x24   : > { %p2813_p6 = scmp.ne.s32.totalorder %s217_s10, %s2812_s21  ;;  %p2821_p3 = scmp.lt.s32.totalorder %s2812_s21, %s2812_s21 }
  0x26   : > { %p2815_p9 = pnand %p2813_p6, %p3148_p0  ;;  %p2822_p8 = por %p2821_p3, %p2820_p7 }
  0x28   : > { %p2816_p11 = pneg %p2815_p9 }
  0x2a   : > { %p2823_p12 = pnand %p2822_p8, %p2816_p11 }
  0x2c   : > { %2826 = shalt.err (!%p2823_p12)
}
  0x2d   : > { %s3020_s9 = smov 128   ;;  %s3021_s13 = smov 8  }
  0x2e   : > { %2579 = dma.hbm_to_vmem [thread:$0]  (!%p3131_p10), %s3919_s1, 2048, %s217_s10, [#allocation8], %s3020_s9, %s3020_s9, %s3021_s13  }
  0x2f   : > { %s3022_s16 = smov [#allocation4]   ;;  %s3023_s19 = smov [#allocation9]  }
  0x30   : > { %s203_s17 = sshll.u32 %s3022_s16, 4  ;;  %s232_s20 = sshll.u32 %s3023_s19, 4  ;;  %s204_s17 = int_to_ptr.vmem [resolvable:$true] %s203_s17  ;;  %s233_s20 = int_to_ptr.vmem [resolvable:$true] %s232_s20 }
  0x31   : > { %s2827_s6 = scalar_lea.hbm %s3918_s0, 4096 }
  0x32   : > { %p2828_p3 = scmp.ne.s32.totalorder %s3918_s0, %s2827_s6  ;;  %p2834_p12 = scmp.lt.u32.totalorder %s2827_s6, %s3918_s0 }
  0x34   : > { %p2830_p7 = pnand %p2828_p3, %p3148_p0 }
  0x36   : > { %p2831_p8 = pneg %p2830_p7 }
  0x38   : > { %p2836_p13 = pnand %p2834_p12, %p2831_p8 }
  0x3a   : > { %2839 = shalt.err (!%p2836_p13)
}
  0x3b   : > { %s2840_s10 = scalar_lea.vmem %s204_s17, 4096  ;;  %p2848_p5 = scmp.lt.s32.totalorder %s204_s17, %s204_s17 }
  0x3c   : > { %p2841_p1 = scmp.ne.s32.totalorder %s204_s17, %s2840_s10  ;;  %p2849_p6 = scmp.lt.s32.totalorder %s2840_s10, %s2840_s10 }
  0x3e   : > { %p2843_p2 = pnand %p2841_p1, %p3148_p0  ;;  %p2850_p9 = por %p2849_p6, %p2848_p5 }
  0x40   : > { %p2844_p4 = pneg %p2843_p2 }
  0x42   : > { %p2851_p11 = pnand %p2850_p9, %p2844_p4 }
  0x44   : > { %2854 = shalt.err (!%p2851_p11)
}
  0x45   : > { %2576 = dma.hbm_to_vmem [thread:$0]  (!%p3131_p10), %s3918_s0, 4096, %s204_s17, [#allocation5], %s3020_s9, %s3020_s9, %s3021_s13  }
  0x46   : > { %s2855_s28 = scalar_lea.hbm %s3921_s3, 2048 }
  0x47   : > { %p2856_p3 = scmp.ne.s32.totalorder %s3921_s3, %s2855_s28  ;;  %p2862_p12 = scmp.lt.u32.totalorder %s2855_s28, %s3921_s3 }
  0x49   : > { %p2858_p7 = pnand %p2856_p3, %p3148_p0 }
  0x4b   : > { %p2859_p8 = pneg %p2858_p7 }
  0x4d   : > { %p2864_p13 = pnand %p2862_p12, %p2859_p8 }
  0x4f   : > { %2867 = shalt.err (!%p2864_p13)
}
  0x50   : > { %s2868_s19 = scalar_lea.vmem %s233_s20, 2048  ;;  %p2876_p5 = scmp.lt.s32.totalorder %s233_s20, %s233_s20 }
  0x51   : > { %p2869_p1 = scmp.ne.s32.totalorder %s233_s20, %s2868_s19  ;;  %p2877_p6 = scmp.lt.s32.totalorder %s2868_s19, %s2868_s19 }
  0x53   : > { %p2871_p2 = pnand %p2869_p1, %p3148_p0  ;;  %p2878_p9 = por %p2877_p6, %p2876_p5 }
  0x55   : > { %p2872_p4 = pneg %p2871_p2 }
  0x57   : > { %p2879_p11 = pnand %p2878_p9, %p2872_p4 }
  0x59   : > { %2882 = shalt.err (!%p2879_p11)
}
  0x5a   : > { %2582 = dma.hbm_to_vmem [thread:$0]  (!%p3131_p10), %s3921_s3, 2048, %s233_s20, [#allocation8], %s3020_s9, %s3020_s9, %s3021_s13  }
  0x5b   : > { %s31_s18 = sadd.s32 1, %s3009_s26  ;;  %s34_s10 = sadd.s32 1, %s3013_s27 }
  0x5c   : > { %p32_p0 = scmp.ge.s32.totalorder %s31_s18, 2  ;;  %s146_s2 = sadd.s32 1, %s2997_s23 }
  0x5d   : > { %s249_s11 = sand.u32 1, %s2997_s23   ;;  %s2014_s24 = sshll.u32 %s3009_s26, 7 }
  0x5e   : > { %s3969_s18 = smov (%p32_p0, %s31_s18), 0  ;;  %s3971_s10 = smov (!%p32_p0, %s34_s10), %s3013_s27 }
  0x5f   : > { %s143_s4 = ssub.s32 %s3009_s26, %s3969_s18  ;;  %p36_p3 = scmp.ge.s32.totalorder %s3971_s10, 2 }
  0x60   : > { %p144_p7 = scmp.eq.s32.totalorder %s143_s4, 0  ;;  %s2013_s6 = sshll.u32 %s249_s11, 8 }
  0x61   : > { %s3973_s10 = smov (%p36_p3, %s3971_s10), 0  ;;  %s3227_s14 = scalar_lea.hbm %s3923_s5, %s2014_s24 }
  0x62   : > { %s3222_s28 = scalar_select %p144_p7, %s2997_s23, %s146_s2  }
  0x63   : > { %s253_s15 = scalar_lea.vmem [#allocation10], %s2013_s6  ;;  %s3231_s19 = scalar_lea.sflag [#allocation11], %s249_s11 }
  0x64   : > { %s259_s16 = sshll.u32 %s253_s15, 4  ;;  %s2883_s17 = scalar_lea.hbm %s3227_s14, 4096  ;;  %s3229_s16 = int_to_ptr.vmem [resolvable:$true] %s259_s16 }
  0x65   : > { %p2884_p10 = scmp.ne.s32.totalorder %s3227_s14, %s2883_s17  ;;  %p3945_p8 = scmp.ne.s32.totalorder %s3943_s12, 0 }
  0x66   : > { %s2888_s4 = scalar_lea.hbm %s3923_s5, 8192  ;;  %p2889_p2 = scmp.lt.u32.totalorder %s3227_s14, %s3923_s5 }
  0x67   : > { %p2885_p12 = pneg %p3945_p8  ;;  %p2890_p4 = scmp.lt.u32.totalorder %s2888_s4, %s2883_s17 }
  0x68   : > { %p2892_p6 = scmp.lt.u32.totalorder %s2883_s17, %s3227_s14 }
  0x69   : > { %p2886_p13 = pnand %p2885_p12, %p2884_p10  ;;  %p2891_p5 = por %p2890_p4, %p2889_p2 }
  0x6b   : > { %p2887_p1 = pneg %p2886_p13  ;;  %p2893_p9 = por %p2892_p6, %p2891_p5 }
  0x6d   : > { %p2894_p11 = pnand %p2893_p9, %p2887_p1 }
  0x6f   : > { %2897 = shalt.err (!%p2894_p11)
}
  0x70   : > { %s2898_s11 = scalar_lea.vmem %s3229_s16, 4096  ;;  %s3024_s6 = smov [#allocation10]  }
  0x71   : > { %p2899_p0 = scmp.ne.s32.totalorder %s3229_s16, %s2898_s11  ;;  %s2903_s29 = sshll.u32 %s3024_s6, 4  ;;  %s2904_s29 = int_to_ptr.vmem [resolvable:$false] %s2903_s29 }
  0x72   : > { %s2905_s15 = scalar_lea.vmem %s2904_s29, 8192  ;;  %p2906_p10 = scmp.lt.s32.totalorder %s3229_s16, %s2904_s29 }
  0x73   : > { %p2901_p3 = pnand %p2899_p0, %p2885_p12  ;;  %p2907_p13 = scmp.lt.s32.totalorder %s2905_s15, %s2898_s11 }
  0x75   : > { %p2902_p7 = pneg %p2901_p3  ;;  %p2908_p2 = por %p2907_p13, %p2906_p10 }
  0x77   : > { %p2909_p4 = pnand %p2908_p2, %p2902_p7 }
  0x79   : > { %2912 = shalt.err (!%p2909_p4)
}
  0x7a   : > { %s3025_s17 = smov 256   ;;  %p3946_p12 = scmp.ne.s32.totalorder %s3941_s8, 0 }
  0x7b   : > { %2586 = dma.hbm_to_vmem [thread:$0]  (!%p3945_p8), %s3227_s14, 4096, %s3229_s16, %s3231_s19, %s3025_s17, %s3020_s9, %s3021_s13  }
  0x7c   : > { %271 = sbr.rel (%p3946_p12) target bundleno = 1395 (0x573), region = 44  ;;  %p3947_p1 = scmp.ne.s32.totalorder (!%p3946_p12), %s3939_s30, 0 }
  0x83   : > { %2972 = dma.done.wait (%p3947_p1), [#allocation5], 4096  }
  0x84   : > { %2974 = vsyncadd (%p3947_p1), [#allocation5], 4294963200 }
  0x85   : > { %2976 = dma.done.wait (%p3947_p1), [#allocation8], 4096  }
  0x86   : > { %2978 = vsyncadd (%p3947_p1), [#allocation8], 4294963200  ;;  %s285_s12 = sand.u32 1, %s2993_s22   ;;  %p3948_p8 = scmp.ne.s32.totalorder %s3940_s7, 0 }
  0x87   : > { %s2019_s21 = sshll.u32 %s285_s12, 8  ;;  %s286_s9 = scalar_lea.sflag [#allocation11], %s285_s12 }
  0x88   : > { %s3272_s13 = scalar_lea.vmem [#allocation10], %s2019_s21 }
  0x89   : > { %2980 = dma.done.wait (%p3948_p8), %s286_s9, 4096  }
  0x8a   : > { %2982 = vsyncadd (%p3948_p8), %s286_s9, 4294963200  ;;  %s3949_s8 = sld [smem:[#allocation17_spill]]  ;;  %p313_p5 = scmp.eq.s32.totalorder %s3005_s25, 0 }
  0x90   : > { %p314_p6 = scmp.eq.s32.totalorder %s3949_s8, 0 }
  0x92   : > { %p315_p9 = pnand %p314_p6, %p313_p5 }
  0x93   : > { %v351_v0 = vld [vmem:[#allocation7] sm:$0xff] (!%p315_p9)  ;;  %v352_v1 = vld [vmem:[#allocation7 + $0x8] sm:$0xff] (!%p315_p9)  ;;  %v353_v2 = vld [vmem:[#allocation7 + $0x10] sm:$0xff] (!%p315_p9)  ;;  %v3026_v56 = vmov (!%p315_p9), 0.0  }
  0x94   : > { %318 = sbr.rel (%p315_p9) target bundleno = 424 (0x1a8), region = 64  ;;  %v2411_v3 = vpack.c.bf16 (!%p315_p9), %v352_v1, %v351_v0  ;;  %v354_v4 = vld [vmem:[#allocation7 + $0x18] sm:$0xff] (!%p315_p9)  ;;  %v355_v6 = vld [vmem:[#allocation7 + $0x20] sm:$0xff] (!%p315_p9)  ;;  %v356_v7 = vld [vmem:[#allocation7 + $0x28] sm:$0xff] (!%p315_p9)  ;;  %624 = vst [vmem:[#allocation3] sm:$0xff] (!%p315_p9), %v3026_v56 }
  0x95   : > { %v2415_v5 = vpack.c.bf16 (!%p315_p9), %v354_v4, %v353_v2  ;;  %v2419_v8 = vpack.c.bf16 (!%p315_p9), %v356_v7, %v355_v6  ;;  %v319_v9 = vld [vmem:[#allocation4] sm:$0xff] (!%p315_p9)  ;;  %v357_v11 = vld [vmem:[#allocation7 + $0x30] sm:$0xff] (!%p315_p9)  ;;  %v358_v12 = vld [vmem:[#allocation7 + $0x38] sm:$0xff] (!%p315_p9)  ;;  %625 = vst [vmem:[#allocation3 + $0x8] sm:$0xff] (!%p315_p9), %v3026_v56 }
  0x96   : > { %2412 = vmatprep.subr.bf16.mxu0 (!%p315_p9), %v2411_v3  ;;  %2507 = vmatprep.subr.bf16.mxu1 (!%p315_p9), %v2411_v3  ;;  %v335_v10 = vld [vmem:[#allocation4 + $0x80] sm:$0xff] (!%p315_p9)  ;;  %v2423_v13 = vpack.c.bf16 (!%p315_p9), %v358_v12, %v357_v11  ;;  %v360_v15 = vld [vmem:[#allocation7 + $0x48] sm:$0xff] (!%p315_p9)  ;;  %v361_v17 = vld [vmem:[#allocation7 + $0x50] sm:$0xff] (!%p315_p9)  ;;  %626 = vst [vmem:[#allocation3 + $0x10] sm:$0xff] (!%p315_p9), %v3026_v56 }
  0x97   : > { %2414 = vmatpush3.bf16.msra.mxu0 (!%p315_p9), %v2411_v3  ;;  %2515 = vmatpush3.bf16.msra.mxu1 (!%p315_p9), %v2411_v3  ;;  %v359_v14 = vld [vmem:[#allocation7 + $0x40] sm:$0xff] (!%p315_p9)  ;;  %v362_v18 = vld [vmem:[#allocation7 + $0x58] sm:$0xff] (!%p315_p9)  ;;  %v364_v21 = vld [vmem:[#allocation7 + $0x68] sm:$0xff] (!%p315_p9)  ;;  %627 = vst [vmem:[#allocation3 + $0x18] sm:$0xff] (!%p315_p9), %v3026_v56 }
  0x98   : > { %2416 = vmatprep.subr.bf16.mxu0 (!%p315_p9), %v2415_v5  ;;  %2508 = vmatprep.subr.bf16.mxu1 (!%p315_p9), %v2415_v5  ;;  %v2427_v16 = vpack.c.bf16 (!%p315_p9), %v360_v15, %v359_v14  ;;  %v2431_v19 = vpack.c.bf16 (!%p315_p9), %v362_v18, %v361_v17  ;;  %v363_v20 = vld [vmem:[#allocation7 + $0x60] sm:$0xff] (!%p315_p9)  ;;  %v365_v23 = vld [vmem:[#allocation7 + $0x70] sm:$0xff] (!%p315_p9)  ;;  %v366_v24 = vld [vmem:[#allocation7 + $0x78] sm:$0xff] (!%p315_p9)  ;;  %628 = vst [vmem:[#allocation3 + $0x20] sm:$0xff] (!%p315_p9), %v3026_v56 }
  0x99   : > { %2203 = vmatprep.mubr.f32.mxu0 (!%p315_p9), %v319_v9  ;;  %2227 = vmatprep.mubr.f32.mxu1 (!%p315_p9), %v335_v10  ;;  %v2435_v22 = vpack.c.bf16 (!%p315_p9), %v364_v21, %v363_v20  ;;  %v2439_v25 = vpack.c.bf16 (!%p315_p9), %v366_v24, %v365_v23  ;;  %v320_v26 = vld [vmem:[#allocation4 + $0x8] sm:$0xff] (!%p315_p9)  ;;  %v321_v28 = vld [vmem:[#allocation4 + $0x10] sm:$0xff] (!%p315_p9)  ;;  %v322_v30 = vld [vmem:[#allocation4 + $0x18] sm:$0xff] (!%p315_p9)  ;;  %629 = vst [vmem:[#allocation3 + $0x28] sm:$0xff] (!%p315_p9), %v3026_v56 }
  0x9a   : > { %v336_v27 = vld [vmem:[#allocation4 + $0x88] sm:$0xff] (!%p315_p9)  ;;  %v337_v29 = vld [vmem:[#allocation4 + $0x90] sm:$0xff] (!%p315_p9)  ;;  %v338_v31 = vld [vmem:[#allocation4 + $0x98] sm:$0xff] (!%p315_p9)  ;;  %630 = vst [vmem:[#allocation3 + $0x30] sm:$0xff] (!%p315_p9), %v3026_v56 }
  0x9b   : > { %2418 = vmatpush3.bf16.msra.mxu0 %v2415_v5  ;;  %2516 = vmatpush3.bf16.msra.mxu1 %v2415_v5  ;;  %v323_v32 = vld [vmem:[#allocation4 + $0x20] sm:$0xff]  ;;  %v324_v34 = vld [vmem:[#allocation4 + $0x28] sm:$0xff]  ;;  %v325_v36 = vld [vmem:[#allocation4 + $0x30] sm:$0xff]  ;;  %631 = vst [vmem:[#allocation3 + $0x38] sm:$0xff] %v3026_v56 }
  0x9c   : > { %2420 = vmatprep.subr.bf16.mxu0 %v2419_v8  ;;  %2509 = vmatprep.subr.bf16.mxu1 %v2419_v8  ;;  %v339_v33 = vld [vmem:[#allocation4 + $0xa0] sm:$0xff]  ;;  %v340_v35 = vld [vmem:[#allocation4 + $0xa8] sm:$0xff]  ;;  %v341_v37 = vld [vmem:[#allocation4 + $0xb0] sm:$0xff]  ;;  %632 = vst [vmem:[#allocation3 + $0x40] sm:$0xff] %v3026_v56 }
  0x9d   : > { %v326_v38 = vld [vmem:[#allocation4 + $0x38] sm:$0xff]  ;;  %v327_v40 = vld [vmem:[#allocation4 + $0x40] sm:$0xff]  ;;  %v328_v42 = vld [vmem:[#allocation4 + $0x48] sm:$0xff]  ;;  %633 = vst [vmem:[#allocation3 + $0x48] sm:$0xff] %v3026_v56 }
  0x9e   : > { %v342_v39 = vld [vmem:[#allocation4 + $0xb8] sm:$0xff]  ;;  %v343_v41 = vld [vmem:[#allocation4 + $0xc0] sm:$0xff]  ;;  %v344_v43 = vld [vmem:[#allocation4 + $0xc8] sm:$0xff]  ;;  %634 = vst [vmem:[#allocation3 + $0x50] sm:$0xff] %v3026_v56 }
  0x9f   : > { %2422 = vmatpush3.bf16.msra.mxu0 %v2419_v8  ;;  %2517 = vmatpush3.bf16.msra.mxu1 %v2419_v8  ;;  %v329_v44 = vld [vmem:[#allocation4 + $0x50] sm:$0xff]  ;;  %v330_v46 = vld [vmem:[#allocation4 + $0x58] sm:$0xff]  ;;  %v331_v48 = vld [vmem:[#allocation4 + $0x60] sm:$0xff]  ;;  %635 = vst [vmem:[#allocation3 + $0x58] sm:$0xff] %v3026_v56 }
  0xa0   : > { %2424 = vmatprep.subr.bf16.mxu0 %v2423_v13  ;;  %2510 = vmatprep.subr.bf16.mxu1 %v2423_v13  ;;  %v345_v45 = vld [vmem:[#allocation4 + $0xd0] sm:$0xff]  ;;  %v346_v47 = vld [vmem:[#allocation4 + $0xd8] sm:$0xff]  ;;  %v347_v49 = vld [vmem:[#allocation4 + $0xe0] sm:$0xff]  ;;  %636 = vst [vmem:[#allocation3 + $0x60] sm:$0xff] %v3026_v56 }
  0xa1   : > { %v332_v50 = vld [vmem:[#allocation4 + $0x68] sm:$0xff]  ;;  %v333_v52 = vld [vmem:[#allocation4 + $0x70] sm:$0xff]  ;;  %v334_v54 = vld [vmem:[#allocation4 + $0x78] sm:$0xff]  ;;  %637 = vst [vmem:[#allocation3 + $0x68] sm:$0xff] %v3026_v56 }
  0xa2   : > { %v348_v51 = vld [vmem:[#allocation4 + $0xe8] sm:$0xff]  ;;  %v349_v53 = vld [vmem:[#allocation4 + $0xf0] sm:$0xff]  ;;  %v350_v55 = vld [vmem:[#allocation4 + $0xf8] sm:$0xff]  ;;  %638 = vst [vmem:[#allocation3 + $0x70] sm:$0xff] %v3026_v56 }
  0xa3   : > { %2426 = vmatpush3.bf16.msra.mxu0 %v2423_v13  ;;  %2518 = vmatpush3.bf16.msra.mxu1 %v2423_v13  ;;  %639 = vst [vmem:[#allocation3 + $0x78] sm:$0xff] %v3026_v56  ;;  %640 = vst [vmem:[#allocation3 + $0x80] sm:$0xff] %v3026_v56 }
  0xa4   : > { %2428 = vmatprep.subr.bf16.mxu0 %v2427_v16  ;;  %2511 = vmatprep.subr.bf16.mxu1 %v2427_v16  ;;  %641 = vst [vmem:[#allocation3 + $0x88] sm:$0xff] %v3026_v56  ;;  %642 = vst [vmem:[#allocation3 + $0x90] sm:$0xff] %v3026_v56 }
  0xa5   : > { %643 = vst [vmem:[#allocation3 + $0x98] sm:$0xff] %v3026_v56  ;;  %644 = vst [vmem:[#allocation3 + $0xa0] sm:$0xff] %v3026_v56 }
  0xa6   : > { %645 = vst [vmem:[#allocation3 + $0xa8] sm:$0xff] %v3026_v56  ;;  %646 = vst [vmem:[#allocation3 + $0xb0] sm:$0xff] %v3026_v56 }
  0xa7   : > { %2430 = vmatpush3.bf16.msra.mxu0 %v2427_v16  ;;  %2519 = vmatpush3.bf16.msra.mxu1 %v2427_v16  ;;  %647 = vst [vmem:[#allocation3 + $0xb8] sm:$0xff] %v3026_v56  ;;  %648 = vst [vmem:[#allocation3 + $0xc0] sm:$0xff] %v3026_v56 }
  0xa8   : > { %2432 = vmatprep.subr.bf16.mxu0 %v2431_v19  ;;  %2512 = vmatprep.subr.bf16.mxu1 %v2431_v19  ;;  %649 = vst [vmem:[#allocation3 + $0xc8] sm:$0xff] %v3026_v56  ;;  %650 = vst [vmem:[#allocation3 + $0xd0] sm:$0xff] %v3026_v56 }
  0xa9   : > { %651 = vst [vmem:[#allocation3 + $0xd8] sm:$0xff] %v3026_v56  ;;  %652 = vst [vmem:[#allocation3 + $0xe0] sm:$0xff] %v3026_v56 }
  0xaa   : > { %653 = vst [vmem:[#allocation3 + $0xe8] sm:$0xff] %v3026_v56  ;;  %654 = vst [vmem:[#allocation3 + $0xf0] sm:$0xff] %v3026_v56 }
  0xab   : > { %2434 = vmatpush3.bf16.msra.mxu0 %v2431_v19  ;;  %2520 = vmatpush3.bf16.msra.mxu1 %v2431_v19  ;;  %655 = vst [vmem:[#allocation3 + $0xf8] sm:$0xff] %v3026_v56 }
  0xac   : > { %2436 = vmatprep.subr.bf16.mxu0 %v2435_v22  ;;  %2513 = vmatprep.subr.bf16.mxu1 %v2435_v22 }
  0xaf   : > { %2438 = vmatpush3.bf16.msra.mxu0 %v2435_v22  ;;  %2521 = vmatpush3.bf16.msra.mxu1 %v2435_v22 }
  0xb0   : > { %2440 = vmatprep.subr.bf16.mxu0 %v2439_v25  ;;  %2514 = vmatprep.subr.bf16.mxu1 %v2439_v25 }
  0xb3   : > { %2442 = vmatpush3.bf16.msra.mxu0 %v2439_v25  ;;  %2522 = vmatpush3.bf16.msra.mxu1 %v2439_v25 }
  0xb6   : > { %2204 = vmatmul.mubr.f32.vlgmr.msra.gmra.mrb[0].mxu0 %v320_v26  ;;  %2228 = vmatmul.mubr.f32.vlgmr.msra.gmra.mrb[0].mxu1 %v336_v27 }
  0xb7   : > { %2206 = vmatprep.mubr.f32.mxu0 %v321_v28  ;;  %2230 = vmatprep.mubr.f32.mxu1 %v337_v29 }
  0xba   : > { %2207 = vmatmul.mubr.f32.gmra.mrb[2].mxu0 %v322_v30  ;;  %2231 = vmatmul.mubr.f32.gmra.mrb[2].mxu1 %v338_v31 }
  0xbb   : > { %2209 = vmatprep.mubr.f32.mxu0 %v323_v32  ;;  %2233 = vmatprep.mubr.f32.mxu1 %v339_v33 }
  0xbe   : > { %2210 = vmatmul.mubr.f32.gmra.mrb[4].mxu0 %v324_v34  ;;  %2234 = vmatmul.mubr.f32.gmra.mrb[4].mxu1 %v340_v35 }
  0xbf   : > { %2212 = vmatprep.mubr.f32.mxu0 %v325_v36  ;;  %2236 = vmatprep.mubr.f32.mxu1 %v341_v37 }
  0xc2   : > { %2213 = vmatmul.mubr.f32.gmra.mrb[6].mxu0 %v326_v38  ;;  %2237 = vmatmul.mubr.f32.gmra.mrb[6].mxu1 %v342_v39 }
  0xc3   : > { %2215 = vmatprep.mubr.f32.mxu0 %v327_v40  ;;  %2239 = vmatprep.mubr.f32.mxu1 %v343_v41 }
  0xc6   : > { %2216 = vmatmul.mubr.f32.gmra.mrb[8].mxu0 %v328_v42  ;;  %2240 = vmatmul.mubr.f32.gmra.mrb[8].mxu1 %v344_v43 }
  0xc7   : > { %2218 = vmatprep.mubr.f32.mxu0 %v329_v44  ;;  %2242 = vmatprep.mubr.f32.mxu1 %v345_v45 }
  0xca   : > { %2219 = vmatmul.mubr.f32.gmra.mrb[10].mxu0 %v330_v46  ;;  %2243 = vmatmul.mubr.f32.gmra.mrb[10].mxu1 %v346_v47 }
  0xcb   : > { %2221 = vmatprep.mubr.f32.mxu0 %v331_v48  ;;  %2245 = vmatprep.mubr.f32.mxu1 %v347_v49 }
  0xce   : > { %2222 = vmatmul.mubr.f32.gmra.mrb[12].mxu0 %v332_v50  ;;  %2246 = vmatmul.mubr.f32.gmra.mrb[12].mxu1 %v348_v51 }
  0xcf   : > { %2224 = vmatprep.mubr.f32.mxu0 %v333_v52  ;;  %2248 = vmatprep.mubr.f32.mxu1 %v349_v53 }
  0xd2   : > { %2225 = vmatmul.mubr.f32.gmra.mrb[14].mxu0 %v334_v54  ;;  %2249 = vmatmul.mubr.f32.gmra.mrb[14].mxu1 %v350_v55 }
 0x189   : > { %v2205_v57 = vpop.f32.mrb[0].mxu0  ;;  %v2229_v58 = vpop.f32.mrb[0].mxu1 }
 0x18a   : > { %593 = vst [vmem:[#allocation2 + $0x8] sm:$0xff] %v2205_v57  ;;  %609 = vst [vmem:[#allocation2 + $0x88] sm:$0xff] %v2229_v58  ;;  %v433_v59 = vpop.f32.mrb[1].mxu0  ;;  %v513_v60 = vpop.f32.mrb[1].mxu1 }
 0x18b   : > { %592 = vst [vmem:[#allocation2] sm:$0xff] %v433_v59  ;;  %608 = vst [vmem:[#allocation2 + $0x80] sm:$0xff] %v513_v60 }
 0x18d   : > { %v2208_v61 = vpop.f32.mrb[2].mxu0  ;;  %v2232_v62 = vpop.f32.mrb[2].mxu1 }
 0x18e   : > { %595 = vst [vmem:[#allocation2 + $0x18] sm:$0xff] %v2208_v61  ;;  %611 = vst [vmem:[#allocation2 + $0x98] sm:$0xff] %v2232_v62  ;;  %v443_v63 = vpop.f32.mrb[3].mxu0  ;;  %v523_v0 = vpop.f32.mrb[3].mxu1 }
 0x18f   : > { %594 = vst [vmem:[#allocation2 + $0x10] sm:$0xff] %v443_v63  ;;  %610 = vst [vmem:[#allocation2 + $0x90] sm:$0xff] %v523_v0 }
 0x191   : > { %v2211_v1 = vpop.f32.mrb[4].mxu0  ;;  %v2235_v2 = vpop.f32.mrb[4].mxu1 }
 0x192   : > { %597 = vst [vmem:[#allocation2 + $0x28] sm:$0xff] %v2211_v1  ;;  %613 = vst [vmem:[#allocation2 + $0xa8] sm:$0xff] %v2235_v2  ;;  %v453_v3 = vpop.f32.mrb[5].mxu0  ;;  %v533_v4 = vpop.f32.mrb[5].mxu1 }
 0x193   : > { %596 = vst [vmem:[#allocation2 + $0x20] sm:$0xff] %v453_v3  ;;  %612 = vst [vmem:[#allocation2 + $0xa0] sm:$0xff] %v533_v4 }
 0x195   : > { %v2214_v5 = vpop.f32.mrb[6].mxu0  ;;  %v2238_v6 = vpop.f32.mrb[6].mxu1 }
 0x196   : > { %599 = vst [vmem:[#allocation2 + $0x38] sm:$0xff] %v2214_v5  ;;  %615 = vst [vmem:[#allocation2 + $0xb8] sm:$0xff] %v2238_v6  ;;  %v463_v7 = vpop.f32.mrb[7].mxu0  ;;  %v543_v8 = vpop.f32.mrb[7].mxu1 }
 0x197   : > { %598 = vst [vmem:[#allocation2 + $0x30] sm:$0xff] %v463_v7  ;;  %614 = vst [vmem:[#allocation2 + $0xb0] sm:$0xff] %v543_v8 }
 0x199   : > { %v2217_v9 = vpop.f32.mrb[8].mxu0  ;;  %v2241_v10 = vpop.f32.mrb[8].mxu1 }
 0x19a   : > { %601 = vst [vmem:[#allocation2 + $0x48] sm:$0xff] %v2217_v9  ;;  %617 = vst [vmem:[#allocation2 + $0xc8] sm:$0xff] %v2241_v10  ;;  %v473_v11 = vpop.f32.mrb[9].mxu0  ;;  %v553_v12 = vpop.f32.mrb[9].mxu1 }
 0x19b   : > { %600 = vst [vmem:[#allocation2 + $0x40] sm:$0xff] %v473_v11  ;;  %616 = vst [vmem:[#allocation2 + $0xc0] sm:$0xff] %v553_v12 }
 0x19d   : > { %v2220_v13 = vpop.f32.mrb[10].mxu0  ;;  %v2244_v14 = vpop.f32.mrb[10].mxu1 }
 0x19e   : > { %603 = vst [vmem:[#allocation2 + $0x58] sm:$0xff] %v2220_v13  ;;  %619 = vst [vmem:[#allocation2 + $0xd8] sm:$0xff] %v2244_v14  ;;  %v483_v15 = vpop.f32.mrb[11].mxu0  ;;  %v563_v16 = vpop.f32.mrb[11].mxu1 }
 0x19f   : > { %602 = vst [vmem:[#allocation2 + $0x50] sm:$0xff] %v483_v15  ;;  %618 = vst [vmem:[#allocation2 + $0xd0] sm:$0xff] %v563_v16 }
 0x1a1   : > { %v2223_v17 = vpop.f32.mrb[12].mxu0  ;;  %v2247_v18 = vpop.f32.mrb[12].mxu1 }
 0x1a2   : > { %605 = vst [vmem:[#allocation2 + $0x68] sm:$0xff] %v2223_v17  ;;  %621 = vst [vmem:[#allocation2 + $0xe8] sm:$0xff] %v2247_v18  ;;  %v493_v19 = vpop.f32.mrb[13].mxu0  ;;  %v573_v20 = vpop.f32.mrb[13].mxu1 }
 0x1a3   : > { %604 = vst [vmem:[#allocation2 + $0x60] sm:$0xff] %v493_v19  ;;  %620 = vst [vmem:[#allocation2 + $0xe0] sm:$0xff] %v573_v20 }
 0x1a5   : > { %v2226_v21 = vpop.f32.mrb[14].mxu0  ;;  %v2250_v22 = vpop.f32.mrb[14].mxu1 }
 0x1a6   : > { %607 = vst [vmem:[#allocation2 + $0x78] sm:$0xff] %v2226_v21  ;;  %623 = vst [vmem:[#allocation2 + $0xf8] sm:$0xff] %v2250_v22  ;;  %v503_v23 = vpop.f32.mrb[15].mxu0  ;;  %v583_v24 = vpop.f32.mrb[15].mxu1 }
 0x1a7   : > { %606 = vst [vmem:[#allocation2 + $0x70] sm:$0xff] %v503_v23  ;;  %622 = vst [vmem:[#allocation2 + $0xf0] sm:$0xff] %v583_v24 }
 0x1a8 PF: > { %s3950_s30 = sld [smem:[#allocation17_spill]]  ;;  %v689_v25 = vld [vmem:[%s3272_s13] sm:$0xff]  ;;  %v690_v51 = vld [vmem:[%s3272_s13 + $0x8] sm:$0xff]  ;;  %v691_v53 = vld [vmem:[%s3272_s13 + $0x10] sm:$0xff] }
 0x1a9   : > { %v705_v26 = vld [vmem:[%s3272_s13 + $0x80] sm:$0xff]  ;;  %2283 = vmatprep.mubr.f32.mxu0 %v689_v25  ;;  %v706_v52 = vld [vmem:[%s3272_s13 + $0x88] sm:$0xff]  ;;  %v707_v54 = vld [vmem:[%s3272_s13 + $0x90] sm:$0xff] }
 0x1aa   : > { %2307 = vmatprep.mubr.f32.mxu1 %v705_v26  ;;  %v692_v55 = vld [vmem:[%s3272_s13 + $0x18] sm:$0xff]  ;;  %v693_v57 = vld [vmem:[%s3272_s13 + $0x20] sm:$0xff]  ;;  %v694_v59 = vld [vmem:[%s3272_s13 + $0x28] sm:$0xff] }
 0x1ab   : > { %v708_v56 = vld [vmem:[%s3272_s13 + $0x98] sm:$0xff]  ;;  %v709_v58 = vld [vmem:[%s3272_s13 + $0xa0] sm:$0xff]  ;;  %v710_v60 = vld [vmem:[%s3272_s13 + $0xa8] sm:$0xff] }
 0x1ac   : > { %v695_v61 = vld [vmem:[%s3272_s13 + $0x30] sm:$0xff]  ;;  %v696_v63 = vld [vmem:[%s3272_s13 + $0x38] sm:$0xff]  ;;  %v697_v1 = vld [vmem:[%s3272_s13 + $0x40] sm:$0xff] }
 0x1ad   : > { %v711_v62 = vld [vmem:[%s3272_s13 + $0xb0] sm:$0xff]  ;;  %v712_v0 = vld [vmem:[%s3272_s13 + $0xb8] sm:$0xff]  ;;  %v713_v2 = vld [vmem:[%s3272_s13 + $0xc0] sm:$0xff] }
 0x1ae   : > { %s2020_s7 = sshll.u32 %s3950_s30, 7  ;;  %v698_v3 = vld [vmem:[%s3272_s13 + $0x48] sm:$0xff]  ;;  %v699_v5 = vld [vmem:[%s3272_s13 + $0x50] sm:$0xff]  ;;  %v700_v7 = vld [vmem:[%s3272_s13 + $0x58] sm:$0xff]  ;;  %p1027_p11 = scmp.eq.s32.totalorder %s3950_s30, 1 }
 0x1af   : > { %s3285_s14 = scalar_lea.vmem [#allocation2], %s2020_s7  ;;  %v714_v4 = vld [vmem:[%s3272_s13 + $0xc8] sm:$0xff]  ;;  %v715_v6 = vld [vmem:[%s3272_s13 + $0xd0] sm:$0xff]  ;;  %v716_v8 = vld [vmem:[%s3272_s13 + $0xd8] sm:$0xff] }
 0x1b0   : > { %v722_v27 = vld [vmem:[%s3285_s14] sm:$0xff]  ;;  %v723_v28 = vld [vmem:[%s3285_s14 + $0x8] sm:$0xff]  ;;  %v724_v29 = vld [vmem:[%s3285_s14 + $0x10] sm:$0xff]  ;;  %p3338_p0 = pnand %p1027_p11, %p313_p5 }
 0x1b1   : > { %v2443_v30 = vpack.c.bf16 %v723_v28, %v722_v27  ;;  %v725_v31 = vld [vmem:[%s3285_s14 + $0x18] sm:$0xff]  ;;  %v726_v33 = vld [vmem:[%s3285_s14 + $0x20] sm:$0xff]  ;;  %v727_v34 = vld [vmem:[%s3285_s14 + $0x28] sm:$0xff]  ;;  %s3952_s4 = sld [smem:[#allocation19_spill]] (!%p3338_p0) }
 0x1b2   : > { %v2447_v32 = vpack.c.bf16 %v725_v31, %v724_v29  ;;  %v2451_v35 = vpack.c.bf16 %v727_v34, %v726_v33  ;;  %v728_v36 = vld [vmem:[%s3285_s14 + $0x30] sm:$0xff]  ;;  %v729_v37 = vld [vmem:[%s3285_s14 + $0x38] sm:$0xff]  ;;  %v730_v39 = vld [vmem:[%s3285_s14 + $0x40] sm:$0xff] }
 0x1b3   : > { %2444 = vmatprep.subr.bf16.mxu0 %v2443_v30  ;;  %2523 = vmatprep.subr.bf16.mxu1 %v2443_v30  ;;  %v2455_v38 = vpack.c.bf16 %v729_v37, %v728_v36  ;;  %v731_v40 = vld [vmem:[%s3285_s14 + $0x48] sm:$0xff]  ;;  %v732_v42 = vld [vmem:[%s3285_s14 + $0x50] sm:$0xff]  ;;  %v733_v43 = vld [vmem:[%s3285_s14 + $0x58] sm:$0xff] }
 0x1b4   : > { %2446 = vmatpush3.bf16.msra.mxu0 %v2443_v30  ;;  %2531 = vmatpush3.bf16.msra.mxu1 %v2443_v30  ;;  %v2459_v41 = vpack.c.bf16 %v731_v40, %v730_v39  ;;  %v2463_v44 = vpack.c.bf16 %v733_v43, %v732_v42  ;;  %v734_v45 = vld [vmem:[%s3285_s14 + $0x60] sm:$0xff]  ;;  %v735_v46 = vld [vmem:[%s3285_s14 + $0x68] sm:$0xff]  ;;  %v736_v48 = vld [vmem:[%s3285_s14 + $0x70] sm:$0xff] }
 0x1b5   : > { %2448 = vmatprep.subr.bf16.mxu0 %v2447_v32  ;;  %2524 = vmatprep.subr.bf16.mxu1 %v2447_v32  ;;  %v2467_v47 = vpack.c.bf16 %v735_v46, %v734_v45  ;;  %v737_v49 = vld [vmem:[%s3285_s14 + $0x78] sm:$0xff]  ;;  %v701_v9 = vld [vmem:[%s3272_s13 + $0x60] sm:$0xff]  ;;  %v702_v11 = vld [vmem:[%s3272_s13 + $0x68] sm:$0xff] }
 0x1b6   : > { %v2471_v50 = vpack.c.bf16 %v737_v49, %v736_v48  ;;  %v717_v10 = vld [vmem:[%s3272_s13 + $0xe0] sm:$0xff]  ;;  %v718_v12 = vld [vmem:[%s3272_s13 + $0xe8] sm:$0xff]  ;;  %v703_v13 = vld [vmem:[%s3272_s13 + $0x70] sm:$0xff] }
 0x1b7   : > { %v719_v14 = vld [vmem:[%s3272_s13 + $0xf0] sm:$0xff]  ;;  %v704_v15 = vld [vmem:[%s3272_s13 + $0x78] sm:$0xff]  ;;  %v658_v17 = vld [vmem:[#allocation3 + $0x8] sm:$0xff] }
 0x1b8   : > { %2450 = vmatpush3.bf16.msra.mxu0 %v2447_v32  ;;  %2532 = vmatpush3.bf16.msra.mxu1 %v2447_v32  ;;  %v720_v16 = vld [vmem:[%s3272_s13 + $0xf8] sm:$0xff]  ;;  %v674_v18 = vld [vmem:[#allocation3 + $0x88] sm:$0xff]  ;;  %v657_v19 = vld [vmem:[#allocation3] sm:$0xff] }
 0x1b9   : > { %2452 = vmatprep.subr.bf16.mxu0 %v2451_v35  ;;  %2525 = vmatprep.subr.bf16.mxu1 %v2451_v35  ;;  %v673_v20 = vld [vmem:[#allocation3 + $0x80] sm:$0xff]  ;;  %v660_v29 = vld [vmem:[#allocation3 + $0x18] sm:$0xff]  ;;  %v659_v31 = vld [vmem:[#allocation3 + $0x10] sm:$0xff] }
 0x1ba   : > { %v676_v30 = vld [vmem:[#allocation3 + $0x98] sm:$0xff]  ;;  %v675_v32 = vld [vmem:[#allocation3 + $0x90] sm:$0xff]  ;;  %v678_v42 = vld [vmem:[#allocation3 + $0xa8] sm:$0xff] }
 0x1bb   : > { %v661_v43 = vld [vmem:[#allocation3 + $0x20] sm:$0xff] }
 0x1bc   : > { %2454 = vmatpush3.bf16.msra.mxu0 %v2451_v35  ;;  %2533 = vmatpush3.bf16.msra.mxu1 %v2451_v35 }
 0x1bd   : > { %2456 = vmatprep.subr.bf16.mxu0 %v2455_v38  ;;  %2526 = vmatprep.subr.bf16.mxu1 %v2455_v38 }
 0x1c0   : > { %2458 = vmatpush3.bf16.msra.mxu0 %v2455_v38  ;;  %2534 = vmatpush3.bf16.msra.mxu1 %v2455_v38 }
 0x1c1   : > { %2460 = vmatprep.subr.bf16.mxu0 %v2459_v41  ;;  %2527 = vmatprep.subr.bf16.mxu1 %v2459_v41 }
 0x1c4   : > { %2462 = vmatpush3.bf16.msra.mxu0 %v2459_v41  ;;  %2535 = vmatpush3.bf16.msra.mxu1 %v2459_v41  ;;  %v662_v41 = vld [vmem:[#allocation3 + $0x28] sm:$0xff] }
 0x1c5   : > { %2464 = vmatprep.subr.bf16.mxu0 %v2463_v44  ;;  %2528 = vmatprep.subr.bf16.mxu1 %v2463_v44 }
 0x1c8   : > { %2466 = vmatpush3.bf16.msra.mxu0 %v2463_v44  ;;  %2536 = vmatpush3.bf16.msra.mxu1 %v2463_v44  ;;  %v677_v44 = vld [vmem:[#allocation3 + $0xa0] sm:$0xff] }
 0x1c9   : > { %2468 = vmatprep.subr.bf16.mxu0 %v2467_v47  ;;  %2529 = vmatprep.subr.bf16.mxu1 %v2467_v47 }
 0x1cc   : > { %2470 = vmatpush3.bf16.msra.mxu0 %v2467_v47  ;;  %2537 = vmatpush3.bf16.msra.mxu1 %v2467_v47 }
 0x1cd   : > { %2472 = vmatprep.subr.bf16.mxu0 %v2471_v50  ;;  %2530 = vmatprep.subr.bf16.mxu1 %v2471_v50 }
 0x1d0   : > { %2474 = vmatpush3.bf16.msra.mxu0 %v2471_v50  ;;  %2538 = vmatpush3.bf16.msra.mxu1 %v2471_v50 }
 0x1d3   : > { %2284 = vmatmul.mubr.f32.vlgmr.msra.gmra.mrb[0].mxu0 %v690_v51  ;;  %2308 = vmatmul.mubr.f32.vlgmr.msra.gmra.mrb[0].mxu1 %v706_v52 }
 0x1d4   : > { %2286 = vmatprep.mubr.f32.mxu0 %v691_v53  ;;  %2310 = vmatprep.mubr.f32.mxu1 %v707_v54  ;;  %v664_v53 = vld [vmem:[#allocation3 + $0x38] sm:$0xff] }
 0x1d5   : > { %v680_v54 = vld [vmem:[#allocation3 + $0xb8] sm:$0xff] }
 0x1d7   : > { %2287 = vmatmul.mubr.f32.gmra.mrb[2].mxu0 %v692_v55  ;;  %2311 = vmatmul.mubr.f32.gmra.mrb[2].mxu1 %v708_v56  ;;  %v663_v55 = vld [vmem:[#allocation3 + $0x30] sm:$0xff] }
 0x1d8   : > { %2289 = vmatprep.mubr.f32.mxu0 %v693_v57  ;;  %2313 = vmatprep.mubr.f32.mxu1 %v709_v58  ;;  %v679_v56 = vld [vmem:[#allocation3 + $0xb0] sm:$0xff] }
 0x1db   : > { %2290 = vmatmul.mubr.f32.gmra.mrb[4].mxu0 %v694_v59  ;;  %2314 = vmatmul.mubr.f32.gmra.mrb[4].mxu1 %v710_v60 }
 0x1dc   : > { %2292 = vmatprep.mubr.f32.mxu0 %v695_v61  ;;  %2316 = vmatprep.mubr.f32.mxu1 %v711_v62 }
 0x1df   : > { %2293 = vmatmul.mubr.f32.gmra.mrb[6].mxu0 %v696_v63  ;;  %2317 = vmatmul.mubr.f32.gmra.mrb[6].mxu1 %v712_v0 }
 0x1e0   : > { %2295 = vmatprep.mubr.f32.mxu0 %v697_v1  ;;  %2319 = vmatprep.mubr.f32.mxu1 %v713_v2  ;;  %v666_v1 = vld [vmem:[#allocation3 + $0x48] sm:$0xff] }
 0x1e1   : > { %v682_v2 = vld [vmem:[#allocation3 + $0xc8] sm:$0xff] }
 0x1e3   : > { %2296 = vmatmul.mubr.f32.gmra.mrb[8].mxu0 %v698_v3  ;;  %2320 = vmatmul.mubr.f32.gmra.mrb[8].mxu1 %v714_v4  ;;  %v665_v3 = vld [vmem:[#allocation3 + $0x40] sm:$0xff] }
 0x1e4   : > { %2298 = vmatprep.mubr.f32.mxu0 %v699_v5  ;;  %2322 = vmatprep.mubr.f32.mxu1 %v715_v6  ;;  %v681_v4 = vld [vmem:[#allocation3 + $0xc0] sm:$0xff] }
 0x1e7   : > { %2299 = vmatmul.mubr.f32.gmra.mrb[10].mxu0 %v700_v7  ;;  %2323 = vmatmul.mubr.f32.gmra.mrb[10].mxu1 %v716_v8 }
 0x1e8   : > { %2301 = vmatprep.mubr.f32.mxu0 %v701_v9  ;;  %2325 = vmatprep.mubr.f32.mxu1 %v717_v10 }
 0x1eb   : > { %2302 = vmatmul.mubr.f32.gmra.mrb[12].mxu0 %v702_v11  ;;  %2326 = vmatmul.mubr.f32.gmra.mrb[12].mxu1 %v718_v12 }
 0x1ec   : > { %2304 = vmatprep.mubr.f32.mxu0 %v703_v13  ;;  %2328 = vmatprep.mubr.f32.mxu1 %v719_v14  ;;  %v668_v13 = vld [vmem:[#allocation3 + $0x58] sm:$0xff] }
 0x1ed   : > { %v684_v14 = vld [vmem:[#allocation3 + $0xd8] sm:$0xff] }
 0x1ef   : > { %2305 = vmatmul.mubr.f32.gmra.mrb[14].mxu0 %v704_v15  ;;  %2329 = vmatmul.mubr.f32.gmra.mrb[14].mxu1 %v720_v16  ;;  %v667_v15 = vld [vmem:[#allocation3 + $0x50] sm:$0xff] }
 0x1f0   : > { %v683_v16 = vld [vmem:[#allocation3 + $0xd0] sm:$0xff] }
 0x2a6   : > { %v2285_v21 = vpop.f32.mrb[0].mxu0  ;;  %v2309_v22 = vpop.f32.mrb[0].mxu1 }
 0x2a7   : > { %v964_v23 = vadd.f32 %v2285_v21, %v658_v17  ;;  %v980_v24 = vadd.f32 %v2309_v22, %v674_v18  ;;  %v804_v25 = vpop.f32.mrb[1].mxu0  ;;  %v884_v26 = vpop.f32.mrb[1].mxu1 }
 0x2a8   : > { %v963_v27 = vadd.f32 %v804_v25, %v657_v19  ;;  %v979_v28 = vadd.f32 %v884_v26, %v673_v20  ;;  %v670_v25 = vld [vmem:[#allocation3 + $0x68] sm:$0xff] }
 0x2a9   : > { %996 = vst [vmem:[#allocation3 + $0x8] sm:$0xff] %v964_v23  ;;  %1012 = vst [vmem:[#allocation3 + $0x88] sm:$0xff] %v980_v24  ;;  %v686_v26 = vld [vmem:[#allocation3 + $0xe8] sm:$0xff] }
 0x2aa   : > { %995 = vst [vmem:[#allocation3] sm:$0xff] %v963_v27  ;;  %1011 = vst [vmem:[#allocation3 + $0x80] sm:$0xff] %v979_v28  ;;  %v2288_v33 = vpop.f32.mrb[2].mxu0  ;;  %v2312_v34 = vpop.f32.mrb[2].mxu1  ;;  %v669_v27 = vld [vmem:[#allocation3 + $0x60] sm:$0xff] }
 0x2ab   : > { %v966_v35 = vadd.f32 %v2288_v33, %v660_v29  ;;  %v982_v36 = vadd.f32 %v2312_v34, %v676_v30  ;;  %v814_v37 = vpop.f32.mrb[3].mxu0  ;;  %v894_v38 = vpop.f32.mrb[3].mxu1  ;;  %v685_v28 = vld [vmem:[#allocation3 + $0xe0] sm:$0xff] }
 0x2ac   : > { %v965_v39 = vadd.f32 %v814_v37, %v659_v31  ;;  %v981_v40 = vadd.f32 %v894_v38, %v675_v32  ;;  %v672_v37 = vld [vmem:[#allocation3 + $0x78] sm:$0xff] }
 0x2ad   : > { %998 = vst [vmem:[#allocation3 + $0x18] sm:$0xff] %v966_v35  ;;  %1014 = vst [vmem:[#allocation3 + $0x98] sm:$0xff] %v982_v36  ;;  %v688_v38 = vld [vmem:[#allocation3 + $0xf8] sm:$0xff] }
 0x2ae   : > { %997 = vst [vmem:[#allocation3 + $0x10] sm:$0xff] %v965_v39  ;;  %1013 = vst [vmem:[#allocation3 + $0x90] sm:$0xff] %v981_v40  ;;  %v2291_v45 = vpop.f32.mrb[4].mxu0  ;;  %v2315_v46 = vpop.f32.mrb[4].mxu1  ;;  %v671_v39 = vld [vmem:[#allocation3 + $0x70] sm:$0xff] }
 0x2af   : > { %v968_v47 = vadd.f32 %v2291_v45, %v662_v41  ;;  %v984_v48 = vadd.f32 %v2315_v46, %v678_v42  ;;  %v824_v49 = vpop.f32.mrb[5].mxu0  ;;  %v904_v50 = vpop.f32.mrb[5].mxu1  ;;  %v687_v40 = vld [vmem:[#allocation3 + $0xf0] sm:$0xff] }
 0x2b0   : > { %v967_v51 = vadd.f32 %v824_v49, %v661_v43  ;;  %v983_v52 = vadd.f32 %v904_v50, %v677_v44  ;;  %v1135_v49 = vld [vmem:[#allocation9] sm:$0xff] (!%p3338_p0)  ;;  %v1136_v50 = vld [vmem:[#allocation9 + $0x8] sm:$0xff] (!%p3338_p0) }
 0x2b1   : > { %1000 = vst [vmem:[#allocation3 + $0x28] sm:$0xff] %v968_v47  ;;  %1016 = vst [vmem:[#allocation3 + $0xa8] sm:$0xff] %v984_v48 }
 0x2b2   : > { %999 = vst [vmem:[#allocation3 + $0x20] sm:$0xff] %v967_v51  ;;  %1015 = vst [vmem:[#allocation3 + $0xa0] sm:$0xff] %v983_v52  ;;  %v2294_v57 = vpop.f32.mrb[6].mxu0  ;;  %v2318_v58 = vpop.f32.mrb[6].mxu1  ;;  %v1137_v51 = vld [vmem:[#allocation9 + $0x10] sm:$0xff] (!%p3338_p0)  ;;  %v2475_v52 = vpack.c.bf16 (!%p3338_p0), %v1136_v50, %v1135_v49 }
 0x2b3   : > { %v970_v59 = vadd.f32 %v2294_v57, %v664_v53  ;;  %v986_v60 = vadd.f32 %v2318_v58, %v680_v54  ;;  %v834_v61 = vpop.f32.mrb[7].mxu0  ;;  %v914_v62 = vpop.f32.mrb[7].mxu1  ;;  %v1138_v53 = vld [vmem:[#allocation9 + $0x18] sm:$0xff] (!%p3338_p0)  ;;  %v1141_v57 = vld [vmem:[#allocation9 + $0x30] sm:$0xff] (!%p3338_p0) }
 0x2b4   : > { %v969_v63 = vadd.f32 %v834_v61, %v663_v55  ;;  %v985_v0 = vadd.f32 %v914_v62, %v679_v56  ;;  %v2479_v54 = vpack.c.bf16 (!%p3338_p0), %v1138_v53, %v1137_v51  ;;  %v1139_v55 = vld [vmem:[#allocation9 + $0x20] sm:$0xff] (!%p3338_p0)  ;;  %v1140_v56 = vld [vmem:[#allocation9 + $0x28] sm:$0xff] (!%p3338_p0)  ;;  %2476 = vmatprep.subr.bf16.mxu0 (!%p3338_p0), %v2475_v52  ;;  %2539 = vmatprep.subr.bf16.mxu1 (!%p3338_p0), %v2475_v52 }
 0x2b5   : > { %1002 = vst [vmem:[#allocation3 + $0x38] sm:$0xff] %v970_v59  ;;  %1018 = vst [vmem:[#allocation3 + $0xb8] sm:$0xff] %v986_v60  ;;  %2478 = vmatpush3.bf16.msra.mxu0 (!%p3338_p0), %v2475_v52  ;;  %2547 = vmatpush3.bf16.msra.mxu1 (!%p3338_p0), %v2475_v52  ;;  %v2483_v58 = vpack.c.bf16 (!%p3338_p0), %v1140_v56, %v1139_v55  ;;  %v1142_v59 = vld [vmem:[#allocation9 + $0x38] sm:$0xff] (!%p3338_p0)  ;;  %v1032_v60 = vld [vmem:[#allocation3] sm:$0xff] (!%p3338_p0) }
 0x2b6   : > { %1001 = vst [vmem:[#allocation3 + $0x30] sm:$0xff] %v969_v63  ;;  %1017 = vst [vmem:[#allocation3 + $0xb0] sm:$0xff] %v985_v0  ;;  %v2297_v5 = vpop.f32.mrb[8].mxu0  ;;  %v2321_v6 = vpop.f32.mrb[8].mxu1  ;;  %2480 = vmatprep.subr.bf16.mxu0 (!%p3338_p0), %v2479_v54  ;;  %2540 = vmatprep.subr.bf16.mxu1 (!%p3338_p0), %v2479_v54  ;;  %v3347_v61 = vld [vmem:[%s3952_s4] ss:$0 sm:$0xff] (!%p3338_p0) }
 0x2b7   : > { %v972_v7 = vadd.f32 %v2297_v5, %v666_v1  ;;  %v988_v8 = vadd.f32 %v2321_v6, %v682_v2  ;;  %v844_v9 = vpop.f32.mrb[9].mxu0  ;;  %v924_v10 = vpop.f32.mrb[9].mxu1  ;;  %v1071_v62 = vadd.f32 (!%p3338_p0), %v3347_v61, %v1032_v60  ;;  %v3027_v63 = vmov (!%p3338_p0), 0.0   ;;  %v1048_v0 = vld [vmem:[#allocation3 + $0x80] sm:$0xff] (!%p3338_p0)  ;;  %v3351_v1 = vld [vmem:[#allocation3 + $0x8] sm:$0xff] (!%p3338_p0)  ;;  %v3361_v5 = vld [vmem:[#allocation3 + $0x90] sm:$0xff] (!%p3338_p0) }
 0x2b8   : > { %v971_v11 = vadd.f32 %v844_v9, %v665_v3  ;;  %v987_v12 = vadd.f32 %v924_v10, %v681_v4  ;;  %1408 = vst [vmem:[#allocation3] sm:$0xff] (!%p3338_p0), %v3027_v63  ;;  %v3353_v2 = vld [vmem:[#allocation3 + $0x88] sm:$0xff] (!%p3338_p0)  ;;  %v1087_v3 = vadd.f32 (!%p3338_p0), %v3347_v61, %v1048_v0  ;;  %1424 = vst [vmem:[#allocation3 + $0x80] sm:$0xff] (!%p3338_p0), %v3027_v63  ;;  %v3359_v4 = vld [vmem:[#allocation3 + $0x10] sm:$0xff] (!%p3338_p0) }
 0x2b9   : > { %1004 = vst [vmem:[#allocation3 + $0x48] sm:$0xff] %v972_v7  ;;  %1020 = vst [vmem:[#allocation3 + $0xc8] sm:$0xff] %v988_v8  ;;  %v3363_v6 = vld [vmem:[#allocation3 + $0x18] sm:$0xff] (!%p3338_p0)  ;;  %2482 = vmatpush3.bf16.msra.mxu0 (!%p3338_p0), %v2479_v54  ;;  %2548 = vmatpush3.bf16.msra.mxu1 (!%p3338_p0), %v2479_v54  ;;  %v1143_v7 = vld [vmem:[#allocation9 + $0x40] sm:$0xff] (!%p3338_p0)  ;;  %v1103_v9 = vmax.f32 (!%p3338_p0), %v1071_v62, 0.0  ;;  %v1073_v49 = vadd.f32 (!%p3338_p0), %v3347_v61, %v3359_v4  ;;  %v1089_v50 = vadd.f32 (!%p3338_p0), %v3347_v61, %v3361_v5 }
 0x2ba   : > { %1003 = vst [vmem:[#allocation3 + $0x40] sm:$0xff] %v971_v11  ;;  %1019 = vst [vmem:[#allocation3 + $0xc0] sm:$0xff] %v987_v12  ;;  %v2300_v17 = vpop.f32.mrb[10].mxu0  ;;  %v2324_v18 = vpop.f32.mrb[10].mxu1  ;;  %v1144_v8 = vld [vmem:[#allocation9 + $0x48] sm:$0xff] (!%p3338_p0)  ;;  %v3368_v10 = vld [vmem:[#allocation3 + $0x98] sm:$0xff] (!%p3338_p0)  ;;  %2484 = vmatprep.subr.bf16.mxu0 (!%p3338_p0), %v2483_v58  ;;  %2541 = vmatprep.subr.bf16.mxu1 (!%p3338_p0), %v2483_v58  ;;  %v1074_v53 = vadd.f32 (!%p3338_p0), %v3347_v61, %v3363_v6 }
 0x2bb   : > { %v974_v19 = vadd.f32 %v2300_v17, %v668_v13  ;;  %v990_v20 = vadd.f32 %v2324_v18, %v684_v14  ;;  %v854_v21 = vpop.f32.mrb[11].mxu0  ;;  %v934_v22 = vpop.f32.mrb[11].mxu1  ;;  %1409 = vst [vmem:[#allocation3 + $0x8] sm:$0xff] (!%p3338_p0), %v3027_v63  ;;  %1425 = vst [vmem:[#allocation3 + $0x88] sm:$0xff] (!%p3338_p0), %v3027_v63  ;;  %v3370_v11 = vld [vmem:[#allocation3 + $0x20] sm:$0xff] (!%p3338_p0)  ;;  %v2487_v13 = vpack.c.bf16 (!%p3338_p0), %v1142_v59, %v1141_v57  ;;  %v1119_v14 = vmax.f32 (!%p3338_p0), %v1087_v3, 0.0 }
 0x2bc   : > { %v973_v23 = vadd.f32 %v854_v21, %v667_v15  ;;  %v989_v24 = vadd.f32 %v934_v22, %v683_v16  ;;  %1410 = vst [vmem:[#allocation3 + $0x10] sm:$0xff] (!%p3338_p0), %v3027_v63  ;;  %1426 = vst [vmem:[#allocation3 + $0x90] sm:$0xff] (!%p3338_p0), %v3027_v63  ;;  %v3372_v12 = vld [vmem:[#allocation3 + $0xa0] sm:$0xff] (!%p3338_p0)  ;;  %v3377_v15 = vld [vmem:[#allocation3 + $0x28] sm:$0xff] (!%p3338_p0)  ;;  %2363 = vmatprep.mubr.f32.mxu0 (!%p3338_p0), %v1103_v9  ;;  %v1090_v54 = vadd.f32 (!%p3338_p0), %v3347_v61, %v3368_v10 }
 0x2bd   : > { %1006 = vst [vmem:[#allocation3 + $0x58] sm:$0xff] %v974_v19  ;;  %1022 = vst [vmem:[#allocation3 + $0xd8] sm:$0xff] %v990_v20  ;;  %v3379_v16 = vld [vmem:[#allocation3 + $0xa8] sm:$0xff] (!%p3338_p0)  ;;  %v3381_v17 = vld [vmem:[#allocation3 + $0x30] sm:$0xff] (!%p3338_p0)  ;;  %2387 = vmatprep.mubr.f32.mxu1 (!%p3338_p0), %v1119_v14  ;;  %2486 = vmatpush3.bf16.msra.mxu0 (!%p3338_p0), %v2483_v58  ;;  %v1105_v55 = vmax.f32 (!%p3338_p0), %v1073_v49, 0.0  ;;  %v1121_v56 = vmax.f32 (!%p3338_p0), %v1089_v50, 0.0  ;;  %v1075_v57 = vadd.f32 (!%p3338_p0), %v3347_v61, %v3370_v11 }
 0x2be   : > { %1005 = vst [vmem:[#allocation3 + $0x50] sm:$0xff] %v973_v23  ;;  %1021 = vst [vmem:[#allocation3 + $0xd0] sm:$0xff] %v989_v24  ;;  %v2303_v29 = vpop.f32.mrb[12].mxu0  ;;  %v2327_v30 = vpop.f32.mrb[12].mxu1  ;;  %v3386_v18 = vld [vmem:[#allocation3 + $0xb0] sm:$0xff] (!%p3338_p0)  ;;  %v3388_v19 = vld [vmem:[#allocation3 + $0x38] sm:$0xff] (!%p3338_p0)  ;;  %2549 = vmatpush3.bf16.msra.mxu1 (!%p3338_p0), %v2483_v58  ;;  %2488 = vmatprep.subr.bf16.mxu0 (!%p3338_p0), %v2487_v13  ;;  %v1091_v58 = vadd.f32 (!%p3338_p0), %v3347_v61, %v3372_v12  ;;  %v1076_v62 = vadd.f32 (!%p3338_p0), %v3347_v61, %v3377_v15 }
 0x2bf   : > { %v976_v31 = vadd.f32 %v2303_v29, %v670_v25  ;;  %v992_v32 = vadd.f32 %v2327_v30, %v686_v26  ;;  %v864_v33 = vpop.f32.mrb[13].mxu0  ;;  %v944_v34 = vpop.f32.mrb[13].mxu1  ;;  %1411 = vst [vmem:[#allocation3 + $0x18] sm:$0xff] (!%p3338_p0), %v3027_v63  ;;  %1427 = vst [vmem:[#allocation3 + $0x98] sm:$0xff] (!%p3338_p0), %v3027_v63  ;;  %v3390_v20 = vld [vmem:[#allocation3 + $0xb8] sm:$0xff] (!%p3338_p0)  ;;  %v1145_v24 = vld [vmem:[#allocation9 + $0x50] sm:$0xff] (!%p3338_p0)  ;;  %2542 = vmatprep.subr.bf16.mxu1 (!%p3338_p0), %v2487_v13  ;;  %v2491_v29 = vpack.c.bf16 (!%p3338_p0), %v1144_v8, %v1143_v7 }
 0x2c0   : > { %v975_v35 = vadd.f32 %v864_v33, %v669_v27  ;;  %v991_v36 = vadd.f32 %v944_v34, %v685_v28  ;;  %1031 = sbr.rel (%p3338_p0) target bundleno = 967 (0x3c7), region = 68  ;;  %1412 = vst [vmem:[#allocation3 + $0x20] sm:$0xff] (!%p3338_p0), %v3027_v63  ;;  %1428 = vst [vmem:[#allocation3 + $0xa0] sm:$0xff] (!%p3338_p0), %v3027_v63  ;;  %v3399_v23 = vld [vmem:[#allocation3 + $0x48] sm:$0xff] (!%p3338_p0)  ;;  %v1146_v25 = vld [vmem:[#allocation9 + $0x58] sm:$0xff] (!%p3338_p0)  ;;  %v1106_v59 = vmax.f32 (!%p3338_p0), %v1074_v53, 0.0  ;;  %v1093_v3 = vadd.f32 (!%p3338_p0), %v3347_v61, %v3386_v18 }
 0x2c1   : > { %1008 = vst [vmem:[#allocation3 + $0x68] sm:$0xff] %v976_v31  ;;  %1024 = vst [vmem:[#allocation3 + $0xe8] sm:$0xff] %v992_v32  ;;  %v3395_v21 = vld [vmem:[#allocation3 + $0x40] sm:$0xff] (!%p3338_p0)  ;;  %v3404_v26 = vld [vmem:[#allocation3 + $0xc8] sm:$0xff] (!%p3338_p0)  ;;  %2490 = vmatpush3.bf16.msra.mxu0 (!%p3338_p0), %v2487_v13  ;;  %v1122_v60 = vmax.f32 (!%p3338_p0), %v1090_v54, 0.0  ;;  %v1107_v0 = vmax.f32 (!%p3338_p0), %v1075_v57, 0.0  ;;  %v1078_v6 = vadd.f32 (!%p3338_p0), %v3347_v61, %v3388_v19  ;;  %v1094_v7 = vadd.f32 (!%p3338_p0), %v3347_v61, %v3390_v20 }
 0x2c2   : > { %1007 = vst [vmem:[#allocation3 + $0x60] sm:$0xff] %v975_v35  ;;  %1023 = vst [vmem:[#allocation3 + $0xe0] sm:$0xff] %v991_v36  ;;  %v2306_v41 = vpop.f32.mrb[14].mxu0  ;;  %v2330_v42 = vpop.f32.mrb[14].mxu1  ;;  %v3397_v22 = vld [vmem:[#allocation3 + $0xc0] sm:$0xff] (!%p3338_p0)  ;;  %2550 = vmatpush3.bf16.msra.mxu1 (!%p3338_p0), %v2487_v13  ;;  %2492 = vmatprep.subr.bf16.mxu0 (!%p3338_p0), %v2491_v29  ;;  %v1108_v4 = vmax.f32 (!%p3338_p0), %v1076_v62, 0.0  ;;  %v1079_v10 = vadd.f32 (!%p3338_p0), %v3347_v61, %v3395_v21  ;;  %v1080_v14 = vadd.f32 (!%p3338_p0), %v3347_v61, %v3399_v23 }
 0x2c3   : > { %v978_v43 = vadd.f32 %v2306_v41, %v672_v37  ;;  %v994_v44 = vadd.f32 %v2330_v42, %v688_v38  ;;  %v874_v45 = vpop.f32.mrb[15].mxu0  ;;  %v954_v46 = vpop.f32.mrb[15].mxu1  ;;  %1413 = vst [vmem:[#allocation3 + $0x28] sm:$0xff] (!%p3338_p0), %v3027_v63  ;;  %1429 = vst [vmem:[#allocation3 + $0xa8] sm:$0xff] (!%p3338_p0), %v3027_v63  ;;  %2543 = vmatprep.subr.bf16.mxu1 (!%p3338_p0), %v2491_v29  ;;  %v1147_v41 = vld [vmem:[#allocation9 + $0x60] sm:$0xff] (!%p3338_p0)  ;;  %v1148_v42 = vld [vmem:[#allocation9 + $0x68] sm:$0xff] (!%p3338_p0)  ;;  %v1095_v11 = vadd.f32 (!%p3338_p0), %v3347_v61, %v3397_v22 }
 0x2c4   : > { %v977_v47 = vadd.f32 %v874_v45, %v671_v39  ;;  %v993_v48 = vadd.f32 %v954_v46, %v687_v40  ;;  %1414 = vst [vmem:[#allocation3 + $0x30] sm:$0xff] (!%p3338_p0), %v3027_v63  ;;  %1430 = vst [vmem:[#allocation3 + $0xb0] sm:$0xff] (!%p3338_p0), %v3027_v63  ;;  %v3413_v30 = vld [vmem:[#allocation3 + $0x58] sm:$0xff] (!%p3338_p0)  ;;  %v2495_v40 = vpack.c.bf16 (!%p3338_p0), %v1146_v25, %v1145_v24  ;;  %v1125_v9 = vmax.f32 (!%p3338_p0), %v1093_v3, 0.0 }
 0x2c5   : > { %1010 = vst [vmem:[#allocation3 + $0x78] sm:$0xff] %v978_v43  ;;  %1026 = vst [vmem:[#allocation3 + $0xf8] sm:$0xff] %v994_v44  ;;  %v3406_v27 = vld [vmem:[#allocation3 + $0x50] sm:$0xff] (!%p3338_p0)  ;;  %v3415_v31 = vld [vmem:[#allocation3 + $0xd8] sm:$0xff] (!%p3338_p0)  ;;  %2494 = vmatpush3.bf16.msra.mxu0 (!%p3338_p0), %v2491_v29  ;;  %v2499_v43 = vpack.c.bf16 (!%p3338_p0), %v1148_v42, %v1147_v41  ;;  %v1110_v12 = vmax.f32 (!%p3338_p0), %v1078_v6, 0.0  ;;  %v1126_v13 = vmax.f32 (!%p3338_p0), %v1094_v7, 0.0  ;;  %v1096_v15 = vadd.f32 (!%p3338_p0), %v3347_v61, %v3404_v26 }
 0x2c6   : > { %1009 = vst [vmem:[#allocation3 + $0x70] sm:$0xff] %v977_v47  ;;  %1025 = vst [vmem:[#allocation3 + $0xf0] sm:$0xff] %v993_v48  ;;  %v3408_v28 = vld [vmem:[#allocation3 + $0xd0] sm:$0xff] (!%p3338_p0)  ;;  %2551 = vmatpush3.bf16.msra.mxu1 (!%p3338_p0), %v2491_v29  ;;  %2496 = vmatprep.subr.bf16.mxu0 (!%p3338_p0), %v2495_v40  ;;  %v1150_v45 = vld [vmem:[#allocation9 + $0x78] sm:$0xff] (!%p3338_p0)  ;;  %v1072_v47 = vadd.f32 (!%p3338_p0), %v3347_v61, %v3351_v1  ;;  %v1088_v48 = vadd.f32 (!%p3338_p0), %v3347_v61, %v3353_v2  ;;  %v1123_v1 = vmax.f32 (!%p3338_p0), %v1091_v58, 0.0 }
 0x2c7   : > { %1415 = vst [vmem:[#allocation3 + $0x38] sm:$0xff] %v3027_v63  ;;  %1431 = vst [vmem:[#allocation3 + $0xb8] sm:$0xff] %v3027_v63  ;;  %2544 = vmatprep.subr.bf16.mxu1 %v2495_v40  ;;  %v1149_v44 = vld [vmem:[#allocation9 + $0x70] sm:$0xff]  ;;  %v1077_v2 = vadd.f32 %v3347_v61, %v3381_v17  ;;  %v1127_v17 = vmax.f32 %v1095_v11, 0.0  ;;  %v1081_v18 = vadd.f32 %v3347_v61, %v3406_v27  ;;  %v1112_v20 = vmax.f32 %v1080_v14, 0.0 }
 0x2c8   : > { %1416 = vst [vmem:[#allocation3 + $0x40] sm:$0xff] %v3027_v63  ;;  %1432 = vst [vmem:[#allocation3 + $0xc0] sm:$0xff] %v3027_v63  ;;  %v3424_v34 = vld [vmem:[#allocation3 + $0x68] sm:$0xff]  ;;  %v2503_v46 = vpack.c.bf16 %v1150_v45, %v1149_v44  ;;  %v1104_v51 = vmax.f32 %v1072_v47, 0.0  ;;  %v1120_v52 = vmax.f32 %v1088_v48, 0.0  ;;  %v1097_v19 = vadd.f32 %v3347_v61, %v3408_v28 }
 0x2c9   : > { %1417 = vst [vmem:[#allocation3 + $0x48] sm:$0xff] %v3027_v63  ;;  %1433 = vst [vmem:[#allocation3 + $0xc8] sm:$0xff] %v3027_v63  ;;  %v3417_v32 = vld [vmem:[#allocation3 + $0x60] sm:$0xff]  ;;  %v3426_v35 = vld [vmem:[#allocation3 + $0xe8] sm:$0xff]  ;;  %2498 = vmatpush3.bf16.msra.mxu0 %v2495_v40  ;;  %v1109_v8 = vmax.f32 %v1077_v2, 0.0  ;;  %v1128_v21 = vmax.f32 %v1096_v15, 0.0  ;;  %v1082_v22 = vadd.f32 %v3347_v61, %v3413_v30  ;;  %v1098_v23 = vadd.f32 %v3347_v61, %v3415_v31 }
 0x2ca   : > { %1418 = vst [vmem:[#allocation3 + $0x50] sm:$0xff] %v3027_v63  ;;  %1434 = vst [vmem:[#allocation3 + $0xd0] sm:$0xff] %v3027_v63  ;;  %v3422_v33 = vld [vmem:[#allocation3 + $0xe0] sm:$0xff]  ;;  %2552 = vmatpush3.bf16.msra.mxu1 %v2495_v40  ;;  %2500 = vmatprep.subr.bf16.mxu0 %v2499_v43  ;;  %v1113_v24 = vmax.f32 %v1081_v18, 0.0  ;;  %v1129_v25 = vmax.f32 %v1097_v19, 0.0  ;;  %v1083_v26 = vadd.f32 %v3347_v61, %v3417_v32 }
 0x2cb   : > { %1419 = vst [vmem:[#allocation3 + $0x58] sm:$0xff] %v3027_v63  ;;  %1435 = vst [vmem:[#allocation3 + $0xd8] sm:$0xff] %v3027_v63  ;;  %2545 = vmatprep.subr.bf16.mxu1 %v2499_v43  ;;  %v1099_v27 = vadd.f32 %v3347_v61, %v3422_v33  ;;  %v1114_v28 = vmax.f32 %v1082_v22, 0.0  ;;  %v1130_v29 = vmax.f32 %v1098_v23, 0.0  ;;  %v1084_v30 = vadd.f32 %v3347_v61, %v3424_v34 }
 0x2cc   : > { %1420 = vst [vmem:[#allocation3 + $0x60] sm:$0xff] %v3027_v63  ;;  %1436 = vst [vmem:[#allocation3 + $0xe0] sm:$0xff] %v3027_v63  ;;  %v3435_v38 = vld [vmem:[#allocation3 + $0x78] sm:$0xff]  ;;  %v1100_v31 = vadd.f32 %v3347_v61, %v3426_v35  ;;  %v1115_v40 = vmax.f32 %v1083_v26, 0.0 }
 0x2cd   : > { %1421 = vst [vmem:[#allocation3 + $0x68] sm:$0xff] %v3027_v63  ;;  %1437 = vst [vmem:[#allocation3 + $0xe8] sm:$0xff] %v3027_v63  ;;  %v3431_v36 = vld [vmem:[#allocation3 + $0x70] sm:$0xff]  ;;  %v3440_v39 = vld [vmem:[#allocation3 + $0xf8] sm:$0xff]  ;;  %2502 = vmatpush3.bf16.msra.mxu0 %v2499_v43  ;;  %v1131_v41 = vmax.f32 %v1099_v27, 0.0  ;;  %v1116_v42 = vmax.f32 %v1084_v30, 0.0  ;;  %v1086_v34 = vadd.f32 %v3347_v61, %v3435_v38 }
 0x2ce   : > { %v3433_v37 = vld [vmem:[#allocation3 + $0xf0] sm:$0xff]  ;;  %1422 = vst [vmem:[#allocation3 + $0x70] sm:$0xff] %v3027_v63  ;;  %1423 = vst [vmem:[#allocation3 + $0x78] sm:$0xff] %v3027_v63  ;;  %2553 = vmatpush3.bf16.msra.mxu1 %v2499_v43  ;;  %2504 = vmatprep.subr.bf16.mxu0 %v2503_v46  ;;  %v1085_v32 = vadd.f32 %v3347_v61, %v3431_v36  ;;  %v1132_v43 = vmax.f32 %v1100_v31, 0.0  ;;  %v1102_v35 = vadd.f32 %v3347_v61, %v3440_v39 }
 0x2cf   : > { %1438 = vst [vmem:[#allocation3 + $0xf0] sm:$0xff] %v3027_v63  ;;  %1439 = vst [vmem:[#allocation3 + $0xf8] sm:$0xff] %v3027_v63  ;;  %2546 = vmatprep.subr.bf16.mxu1 %v2503_v46  ;;  %v1092_v63 = vadd.f32 %v3347_v61, %v3379_v16  ;;  %v1111_v16 = vmax.f32 %v1079_v10, 0.0  ;;  %v1101_v33 = vadd.f32 %v3347_v61, %v3433_v37  ;;  %v1118_v36 = vmax.f32 %v1086_v34, 0.0 }
 0x2d0   : > { %v1117_v44 = vmax.f32 %v1085_v32, 0.0 }
 0x2d1   : > { %2506 = vmatpush3.bf16.msra.mxu0 %v2503_v46  ;;  %v1124_v5 = vmax.f32 %v1092_v63, 0.0  ;;  %v1133_v45 = vmax.f32 %v1101_v33, 0.0 }
 0x2d2   : > { %2554 = vmatpush3.bf16.msra.mxu1 %v2503_v46  ;;  %v1134_v46 = vmax.f32 %v1102_v35, 0.0 }
 0x2d4   : > { %2364 = vmatmul.mubr.f32.vlgmr.msra.gmra.mrb[0].mxu0 %v1104_v51 }
 0x2d5   : > { %2388 = vmatmul.mubr.f32.vlgmr.msra.gmra.mrb[0].mxu1 %v1120_v52  ;;  %2366 = vmatprep.mubr.f32.mxu0 %v1105_v55 }
 0x2d6   : > { %2390 = vmatprep.mubr.f32.mxu1 %v1121_v56 }
 0x2d8   : > { %2367 = vmatmul.mubr.f32.gmra.mrb[2].mxu0 %v1106_v59 }
 0x2d9   : > { %2391 = vmatmul.mubr.f32.gmra.mrb[2].mxu1 %v1122_v60  ;;  %2369 = vmatprep.mubr.f32.mxu0 %v1107_v0 }
 0x2da   : > { %2393 = vmatprep.mubr.f32.mxu1 %v1123_v1 }
 0x2dc   : > { %2370 = vmatmul.mubr.f32.gmra.mrb[4].mxu0 %v1108_v4 }
 0x2dd   : > { %2394 = vmatmul.mubr.f32.gmra.mrb[4].mxu1 %v1124_v5  ;;  %2372 = vmatprep.mubr.f32.mxu0 %v1109_v8 }
 0x2de   : > { %2396 = vmatprep.mubr.f32.mxu1 %v1125_v9 }
 0x2e0   : > { %2373 = vmatmul.mubr.f32.gmra.mrb[6].mxu0 %v1110_v12 }
 0x2e1   : > { %2397 = vmatmul.mubr.f32.gmra.mrb[6].mxu1 %v1126_v13  ;;  %2375 = vmatprep.mubr.f32.mxu0 %v1111_v16 }
 0x2e2   : > { %2399 = vmatprep.mubr.f32.mxu1 %v1127_v17 }
 0x2e4   : > { %2376 = vmatmul.mubr.f32.gmra.mrb[8].mxu0 %v1112_v20 }
 0x2e5   : > { %2400 = vmatmul.mubr.f32.gmra.mrb[8].mxu1 %v1128_v21  ;;  %2378 = vmatprep.mubr.f32.mxu0 %v1113_v24 }
 0x2e6   : > { %2402 = vmatprep.mubr.f32.mxu1 %v1129_v25 }
 0x2e8   : > { %2379 = vmatmul.mubr.f32.gmra.mrb[10].mxu0 %v1114_v28 }
 0x2e9   : > { %2403 = vmatmul.mubr.f32.gmra.mrb[10].mxu1 %v1130_v29  ;;  %2381 = vmatprep.mubr.f32.mxu0 %v1115_v40 }
 0x2ea   : > { %2405 = vmatprep.mubr.f32.mxu1 %v1131_v41 }
 0x2ec   : > { %2382 = vmatmul.mubr.f32.gmra.mrb[12].mxu0 %v1116_v42 }
 0x2ed   : > { %2406 = vmatmul.mubr.f32.gmra.mrb[12].mxu1 %v1132_v43  ;;  %2384 = vmatprep.mubr.f32.mxu0 %v1117_v44 }
 0x2ee   : > { %2408 = vmatprep.mubr.f32.mxu1 %v1133_v45 }
 0x2f0   : > { %2385 = vmatmul.mubr.f32.gmra.mrb[14].mxu0 %v1118_v36 }
 0x2f1   : > { %2409 = vmatmul.mubr.f32.gmra.mrb[14].mxu1 %v1134_v46 }
 0x3a7   : > { %v2365_v37 = vpop.f32.mrb[0].mxu0 }
 0x3a8   : > { %v2389_v47 = vpop.f32.mrb[0].mxu1  ;;  %1377 = vst [vmem:[#allocation2 + $0x8] sm:$0xff] %v2365_v37  ;;  %v1217_v38 = vpop.f32.mrb[1].mxu0 }
 0x3a9   : > { %1393 = vst [vmem:[#allocation2 + $0x88] sm:$0xff] %v2389_v47  ;;  %v1297_v48 = vpop.f32.mrb[1].mxu1  ;;  %1376 = vst [vmem:[#allocation2] sm:$0xff] %v1217_v38 }
 0x3aa   : > { %1392 = vst [vmem:[#allocation2 + $0x80] sm:$0xff] %v1297_v48 }
 0x3ab   : > { %v2368_v61 = vpop.f32.mrb[2].mxu0 }
 0x3ac   : > { %v2392_v39 = vpop.f32.mrb[2].mxu1  ;;  %1379 = vst [vmem:[#allocation2 + $0x18] sm:$0xff] %v2368_v61  ;;  %v1227_v49 = vpop.f32.mrb[3].mxu0 }
 0x3ad   : > { %1395 = vst [vmem:[#allocation2 + $0x98] sm:$0xff] %v2392_v39  ;;  %v1307_v50 = vpop.f32.mrb[3].mxu1  ;;  %1378 = vst [vmem:[#allocation2 + $0x10] sm:$0xff] %v1227_v49 }
 0x3ae   : > { %1394 = vst [vmem:[#allocation2 + $0x90] sm:$0xff] %v1307_v50 }
 0x3af   : > { %v2371_v51 = vpop.f32.mrb[4].mxu0 }
 0x3b0   : > { %v2395_v52 = vpop.f32.mrb[4].mxu1  ;;  %1381 = vst [vmem:[#allocation2 + $0x28] sm:$0xff] %v2371_v51  ;;  %v1237_v53 = vpop.f32.mrb[5].mxu0 }
 0x3b1   : > { %1397 = vst [vmem:[#allocation2 + $0xa8] sm:$0xff] %v2395_v52  ;;  %v1317_v54 = vpop.f32.mrb[5].mxu1  ;;  %1380 = vst [vmem:[#allocation2 + $0x20] sm:$0xff] %v1237_v53 }
 0x3b2   : > { %1396 = vst [vmem:[#allocation2 + $0xa0] sm:$0xff] %v1317_v54 }
 0x3b3   : > { %v2374_v55 = vpop.f32.mrb[6].mxu0 }
 0x3b4   : > { %v2398_v56 = vpop.f32.mrb[6].mxu1  ;;  %1383 = vst [vmem:[#allocation2 + $0x38] sm:$0xff] %v2374_v55  ;;  %v1247_v57 = vpop.f32.mrb[7].mxu0 }
 0x3b5   : > { %1399 = vst [vmem:[#allocation2 + $0xb8] sm:$0xff] %v2398_v56  ;;  %v1327_v58 = vpop.f32.mrb[7].mxu1  ;;  %1382 = vst [vmem:[#allocation2 + $0x30] sm:$0xff] %v1247_v57 }
 0x3b6   : > { %1398 = vst [vmem:[#allocation2 + $0xb0] sm:$0xff] %v1327_v58 }
 0x3b7   : > { %v2377_v59 = vpop.f32.mrb[8].mxu0 }
 0x3b8   : > { %v2401_v60 = vpop.f32.mrb[8].mxu1  ;;  %1385 = vst [vmem:[#allocation2 + $0x48] sm:$0xff] %v2377_v59  ;;  %v1257_v62 = vpop.f32.mrb[9].mxu0 }
 0x3b9   : > { %1401 = vst [vmem:[#allocation2 + $0xc8] sm:$0xff] %v2401_v60  ;;  %v1337_v63 = vpop.f32.mrb[9].mxu1  ;;  %1384 = vst [vmem:[#allocation2 + $0x40] sm:$0xff] %v1257_v62 }
 0x3ba   : > { %1400 = vst [vmem:[#allocation2 + $0xc0] sm:$0xff] %v1337_v63 }
 0x3bb   : > { %v2380_v0 = vpop.f32.mrb[10].mxu0 }
 0x3bc   : > { %v2404_v1 = vpop.f32.mrb[10].mxu1  ;;  %1387 = vst [vmem:[#allocation2 + $0x58] sm:$0xff] %v2380_v0  ;;  %v1267_v2 = vpop.f32.mrb[11].mxu0 }
 0x3bd   : > { %1403 = vst [vmem:[#allocation2 + $0xd8] sm:$0xff] %v2404_v1  ;;  %v1347_v3 = vpop.f32.mrb[11].mxu1  ;;  %1386 = vst [vmem:[#allocation2 + $0x50] sm:$0xff] %v1267_v2 }
 0x3be   : > { %1402 = vst [vmem:[#allocation2 + $0xd0] sm:$0xff] %v1347_v3 }
 0x3bf   : > { %v2383_v4 = vpop.f32.mrb[12].mxu0 }
 0x3c0   : > { %v2407_v5 = vpop.f32.mrb[12].mxu1  ;;  %1389 = vst [vmem:[#allocation2 + $0x68] sm:$0xff] %v2383_v4  ;;  %v1277_v6 = vpop.f32.mrb[13].mxu0 }
 0x3c1   : > { %1405 = vst [vmem:[#allocation2 + $0xe8] sm:$0xff] %v2407_v5  ;;  %v1357_v7 = vpop.f32.mrb[13].mxu1  ;;  %1388 = vst [vmem:[#allocation2 + $0x60] sm:$0xff] %v1277_v6 }
 0x3c2   : > { %1404 = vst [vmem:[#allocation2 + $0xe0] sm:$0xff] %v1357_v7 }
 0x3c3   : > { %v2386_v8 = vpop.f32.mrb[14].mxu0 }
 0x3c4   : > { %v2410_v9 = vpop.f32.mrb[14].mxu1  ;;  %1391 = vst [vmem:[#allocation2 + $0x78] sm:$0xff] %v2386_v8  ;;  %v1287_v10 = vpop.f32.mrb[15].mxu0 }
 0x3c5   : > { %1407 = vst [vmem:[#allocation2 + $0xf8] sm:$0xff] %v2410_v9  ;;  %v1367_v11 = vpop.f32.mrb[15].mxu1  ;;  %1390 = vst [vmem:[#allocation2 + $0x70] sm:$0xff] %v1287_v10 }
 0x3c6   : > { %1406 = vst [vmem:[#allocation2 + $0xf0] sm:$0xff] %v1367_v11 }
 0x3c7 PF: > { %p1440_p3 = scmp.eq.s32.totalorder %s3005_s25, 1 }
 0x3c9   : > { %p1441_p7 = pnand %p1440_p3, %p1027_p11 }
 0x3ca   : > { %v1445_v12 = vld [vmem:[#allocation3] sm:$0xff] (!%p1441_p7)  ;;  %s3954_s6 = sld [smem:[#allocation20_spill]] (!%p1441_p7)  ;;  %v1516_v14 = vlaneseq (!%p1441_p7)  ;;  %v1447_v15 = vld [vmem:[#allocation3 + $0x10] sm:$0xff] (!%p1441_p7)  ;;  %v1446_v18 = vld [vmem:[#allocation3 + $0x8] sm:$0xff] (!%p1441_p7) }
 0x3cb   : > { %1444 = sbr.rel (%p1441_p7) target bundleno = 1359 (0x54f), region = 72  ;;  %v1448_v19 = vld [vmem:[#allocation3 + $0x18] sm:$0xff] (!%p1441_p7)  ;;  %v1449_v23 = vld [vmem:[#allocation3 + $0x20] sm:$0xff] (!%p1441_p7)  ;;  %v1450_v24 = vld [vmem:[#allocation3 + $0x28] sm:$0xff] (!%p1441_p7) }
 0x3cc   : > { %v3513_v20 = vand.u32 (!%p1441_p7), 127, %v1516_v14  ;;  %v1451_v31 = vld [vmem:[#allocation3 + $0x30] sm:$0xff] (!%p1441_p7)  ;;  %v1453_v43 = vld [vmem:[#allocation3 + $0x40] sm:$0xff] (!%p1441_p7)  ;;  %v1454_v34 = vld [vmem:[#allocation3 + $0x48] sm:$0xff] (!%p1441_p7) }
 0x3cd   : > { %v1455_v46 = vld [vmem:[#allocation3 + $0x50] sm:$0xff] (!%p1441_p7)  ;;  %v1456_v37 = vld [vmem:[#allocation3 + $0x58] sm:$0xff] (!%p1441_p7)  ;;  %v1457_v39 = vld [vmem:[#allocation3 + $0x60] sm:$0xff] (!%p1441_p7) }
 0x3ce   : > { %vm1518_vm0 = vcmp.lt.s32.totalorder (!%p1441_p7), %v3513_v20, 7  ;;  %v1452_v40 = vld [vmem:[#allocation3 + $0x38] sm:$0xff] (!%p1441_p7)  ;;  %v1458_v49 = vld [vmem:[#allocation3 + $0x68] sm:$0xff] (!%p1441_p7)  ;;  %v1459_v54 = vld [vmem:[#allocation3 + $0x70] sm:$0xff] (!%p1441_p7) }
 0x3cf   : > { %v1460_v55 = vld [vmem:[#allocation3 + $0x78] sm:$0xff] (!%p1441_p7)  ;;  %v1461_v60 = vld [vmem:[#allocation3 + $0x80] sm:$0xff] (!%p1441_p7)  ;;  %v1462_v62 = vld [vmem:[#allocation3 + $0x88] sm:$0xff] (!%p1441_p7) }
 0x3d0   : > { %v3509_v13 = vld [vmem:[%s3954_s6] ss:$0 sm:$0xff] (!%p1441_p7)  ;;  %v1463_v3 = vld [vmem:[#allocation3 + $0x90] sm:$0xff] (!%p1441_p7)  ;;  %v1464_v4 = vld [vmem:[#allocation3 + $0x98] sm:$0xff] (!%p1441_p7) }
 0x3d1   : > { %v1484_v16 = vadd.f32 (!%p1441_p7), %v3509_v13, %v1445_v12  ;;  %v1486_v17 = vadd.f32 (!%p1441_p7), %v3509_v13, %v1447_v15  ;;  %v1485_v21 = vadd.f32 (!%p1441_p7), %v3509_v13, %v1446_v18  ;;  %v1487_v22 = vadd.f32 (!%p1441_p7), %v3509_v13, %v1448_v19  ;;  %v1465_v9 = vld [vmem:[#allocation3 + $0xa0] sm:$0xff] (!%p1441_p7)  ;;  %v1466_v10 = vld [vmem:[#allocation3 + $0xa8] sm:$0xff] (!%p1441_p7) }
 0x3d2   : > { %v1488_v29 = vadd.f32 %v3509_v13, %v1449_v23  ;;  %v1489_v30 = vadd.f32 %v3509_v13, %v1450_v24  ;;  %v1490_v33 = vadd.f32 %v3509_v13, %v1451_v31  ;;  %v1491_v42 = vadd.f32 %v3509_v13, %v1452_v40  ;;  %v1469_v23 = vld [vmem:[#allocation3 + $0xc0] sm:$0xff]  ;;  %v1470_v24 = vld [vmem:[#allocation3 + $0xc8] sm:$0xff] }
 0x3d3   : > { %v3520_v25 = vsel %vm1518_vm0, %v1484_v16, -1e+30  ;;  %v3524_v26 = vsel %vm1518_vm0, %v1486_v17, -1e+30  ;;  %v3530_v27 = vsel %vm1518_vm0, %v1485_v21, -1e+30  ;;  %v1492_v45 = vadd.f32 %v3509_v13, %v1453_v43 }
 0x3d4   : > { %1551 = vmax.xlane.f32.xlu0 %v3520_v25  ;;  %1555 = vmax.xlane.f32.xlu1 %v3524_v26  ;;  %v3534_v28 = vsel %vm1518_vm0, %v1487_v22, -1e+30  ;;  %v3542_v41 = vsel %vm1518_vm0, %v1488_v29, -1e+30  ;;  %v3546_v32 = vsel %vm1518_vm0, %v1489_v30, -1e+30  ;;  %v1493_v36 = vadd.f32 %v3509_v13, %v1454_v34 }
 0x3d5   : > { %v3554_v35 = vsel %vm1518_vm0, %v1490_v33, -1e+30  ;;  %v3558_v44 = vsel %vm1518_vm0, %v1491_v42, -1e+30  ;;  %v3566_v47 = vsel %vm1518_vm0, %v1492_v45, -1e+30  ;;  %v1494_v48 = vadd.f32 %v3509_v13, %v1455_v46 }
 0x3d6   : > { %v3570_v38 = vsel %vm1518_vm0, %v1493_v36, -1e+30  ;;  %v1495_v61 = vadd.f32 %v3509_v13, %v1456_v37  ;;  %v1496_v52 = vadd.f32 %v3509_v13, %v1457_v39  ;;  %v1497_v53 = vadd.f32 %v3509_v13, %v1458_v49  ;;  %v1467_v16 = vld [vmem:[#allocation3 + $0xb0] sm:$0xff]  ;;  %v1468_v17 = vld [vmem:[#allocation3 + $0xb8] sm:$0xff]  ;;  %v1473_v46 = vld [vmem:[#allocation3 + $0xe0] sm:$0xff] }
 0x3d7   : > { %v3578_v50 = vsel %vm1518_vm0, %v1494_v48, -1e+30  ;;  %v1498_v58 = vadd.f32 %v3509_v13, %v1459_v54  ;;  %v1499_v59 = vadd.f32 %v3509_v13, %v1460_v55  ;;  %v1500_v1 = vadd.f32 %v3509_v13, %v1461_v60  ;;  %v1471_v33 = vld [vmem:[#allocation3 + $0xd0] sm:$0xff]  ;;  %v1472_v42 = vld [vmem:[#allocation3 + $0xd8] sm:$0xff]  ;;  %v1474_v37 = vld [vmem:[#allocation3 + $0xe8] sm:$0xff] }
 0x3d8   : > { %1553 = vmax.xlane.f32.xlu0 %v3530_v27  ;;  %1557 = vmax.xlane.f32.xlu1 %v3534_v28  ;;  %v3582_v51 = vsel %vm1518_vm0, %v1495_v61, -1e+30  ;;  %v3590_v56 = vsel %vm1518_vm0, %v1496_v52, -1e+30  ;;  %v3594_v57 = vsel %vm1518_vm0, %v1497_v53, -1e+30  ;;  %v1501_v2 = vadd.f32 %v3509_v13, %v1462_v62 }
 0x3d9   : > { %v3602_v63 = vsel %vm1518_vm0, %v1498_v58, -1e+30  ;;  %v3606_v0 = vsel %vm1518_vm0, %v1499_v59, -1e+30  ;;  %v3614_v5 = vsel %vm1518_vm0, %v1500_v1, -1e+30  ;;  %v1502_v7 = vadd.f32 %v3509_v13, %v1463_v3 }
 0x3da   : > { %v3618_v6 = vsel %vm1518_vm0, %v1501_v2, -1e+30  ;;  %v1503_v8 = vadd.f32 %v3509_v13, %v1464_v4  ;;  %v1504_v14 = vadd.f32 %v3509_v13, %v1465_v9  ;;  %v1505_v15 = vadd.f32 %v3509_v13, %v1466_v10  ;;  %v1475_v52 = vld [vmem:[#allocation3 + $0xf0] sm:$0xff]  ;;  %v1476_v53 = vld [vmem:[#allocation3 + $0xf8] sm:$0xff] }
 0x3db   : > { %v3626_v11 = vsel %vm1518_vm0, %v1502_v7, -1e+30  ;;  %v1506_v21 = vadd.f32 %v3509_v13, %v1467_v16  ;;  %v1507_v22 = vadd.f32 %v3509_v13, %v1468_v17  ;;  %v1508_v31 = vadd.f32 %v3509_v13, %v1469_v23 }
 0x3dc   : > { %1559 = vmax.xlane.f32.xlu0 %v3542_v41  ;;  %1561 = vmax.xlane.f32.xlu1 %v3546_v32  ;;  %v3630_v12 = vsel %vm1518_vm0, %v1503_v8, -1e+30  ;;  %v3638_v18 = vsel %vm1518_vm0, %v1504_v14, -1e+30  ;;  %v3642_v19 = vsel %vm1518_vm0, %v1505_v15, -1e+30  ;;  %v1509_v40 = vadd.f32 %v3509_v13, %v1470_v24 }
 0x3dd   : > { %v3650_v29 = vsel %vm1518_vm0, %v1506_v21, -1e+30  ;;  %v3654_v30 = vsel %vm1518_vm0, %v1507_v22, -1e+30  ;;  %v3662_v43 = vsel %vm1518_vm0, %v1508_v31, -1e+30  ;;  %v1510_v45 = vadd.f32 %v3509_v13, %v1471_v33 }
 0x3de   : > { %v3666_v34 = vsel %vm1518_vm0, %v1509_v40, -1e+30  ;;  %v1511_v36 = vadd.f32 %v3509_v13, %v1472_v42  ;;  %v1512_v39 = vadd.f32 %v3509_v13, %v1473_v46  ;;  %v1513_v49 = vadd.f32 %v3509_v13, %v1474_v37 }
 0x3df   : > { %v3674_v48 = vsel %vm1518_vm0, %v1510_v45, -1e+30  ;;  %v1514_v58 = vadd.f32 %v3509_v13, %v1475_v52  ;;  %v1515_v59 = vadd.f32 %v3509_v13, %v1476_v53 }
 0x3e0   : > { %1563 = vmax.xlane.f32.xlu0 %v3554_v35  ;;  %1565 = vmax.xlane.f32.xlu1 %v3558_v44  ;;  %v3678_v61 = vsel %vm1518_vm0, %v1511_v36, -1e+30  ;;  %v3686_v54 = vsel %vm1518_vm0, %v1512_v39, -1e+30  ;;  %v3690_v55 = vsel %vm1518_vm0, %v1513_v49, -1e+30 }
 0x3e1   : > { %v3698_v60 = vsel %vm1518_vm0, %v1514_v58, -1e+30  ;;  %v3702_v62 = vsel %vm1518_vm0, %v1515_v59, -1e+30 }
 0x3e4   : > { %1567 = vmax.xlane.f32.xlu0 %v3566_v47  ;;  %1569 = vmax.xlane.f32.xlu1 %v3570_v38 }
 0x3e8   : > { %1571 = vmax.xlane.f32.xlu0 %v3578_v50  ;;  %1573 = vmax.xlane.f32.xlu1 %v3582_v51 }
 0x3ec   : > { %1575 = vmax.xlane.f32.xlu0 %v3590_v56  ;;  %1577 = vmax.xlane.f32.xlu1 %v3594_v57 }
 0x3f0   : > { %1579 = vmax.xlane.f32.xlu0 %v3602_v63  ;;  %1581 = vmax.xlane.f32.xlu1 %v3606_v0 }
 0x3f4   : > { %1583 = vmax.xlane.f32.xlu0 %v3614_v5  ;;  %1585 = vmax.xlane.f32.xlu1 %v3618_v6 }
 0x3f8   : > { %1587 = vmax.xlane.f32.xlu0 %v3626_v11  ;;  %1589 = vmax.xlane.f32.xlu1 %v3630_v12 }
 0x3fc   : > { %1591 = vmax.xlane.f32.xlu0 %v3638_v18  ;;  %1593 = vmax.xlane.f32.xlu1 %v3642_v19 }
 0x400   : > { %1595 = vmax.xlane.f32.xlu0 %v3650_v29  ;;  %1597 = vmax.xlane.f32.xlu1 %v3654_v30 }
 0x404   : > { %1599 = vmax.xlane.f32.xlu0 %v3662_v43  ;;  %1601 = vmax.xlane.f32.xlu1 %v3666_v34 }
 0x408   : > { %1603 = vmax.xlane.f32.xlu0 %v3674_v48  ;;  %1605 = vmax.xlane.f32.xlu1 %v3678_v61 }
 0x40c   : > { %1607 = vmax.xlane.f32.xlu0 %v3686_v54  ;;  %1609 = vmax.xlane.f32.xlu1 %v3690_v55 }
 0x410   : > { %1611 = vmax.xlane.f32.xlu0 %v3698_v60  ;;  %1613 = vmax.xlane.f32.xlu1 %v3702_v62 }
 0x461   : > { %v1552_v1 = vpop.xlane.xlu0 %1551  ;;  %v1556_v2 = vpop.xlane.xlu1 %1555 }
 0x462   : > { %v3707_v13 = vsub.f32 %v3520_v25, %v1552_v1  ;;  %v3710_v3 = vsub.f32 %v3524_v26, %v1556_v2 }
 0x464   : > { %v1647_v4 = vmul.f32 1.442695, %v3707_v13  ;;  %v1651_v7 = vmul.f32 1.442695, %v3710_v3 }
 0x465   : > { %v1554_v8 = vpop.xlane.xlu0 %1553  ;;  %v1558_v20 = vpop.xlane.xlu1 %1557 }
 0x466   : > { %2671 = vpow2.f32 %v1647_v4  ;;  %v3715_v9 = vsub.f32 %v3530_v27, %v1554_v8  ;;  %v3718_v10 = vsub.f32 %v3534_v28, %v1558_v20 }
 0x467   : > { %2673 = vpow2.f32 %v1651_v7 }
 0x468   : > { %v1649_v25 = vmul.f32 1.442695, %v3715_v9  ;;  %v1653_v14 = vmul.f32 1.442695, %v3718_v10 }
 0x469   : > { %v1560_v26 = vpop.xlane.xlu0 %1559  ;;  %v1562_v15 = vpop.xlane.xlu1 %1561 }
 0x46a   : > { %2675 = vpow2.f32 %v1649_v25  ;;  %v3723_v16 = vsub.f32 %v3542_v41, %v1560_v26  ;;  %v3726_v17 = vsub.f32 %v3546_v32, %v1562_v15 }
 0x46b   : > { %2677 = vpow2.f32 %v1653_v14 }
 0x46c   : > { %v1655_v27 = vmul.f32 1.442695, %v3723_v16  ;;  %v1657_v28 = vmul.f32 1.442695, %v3726_v17 }
 0x46d   : > { %v1564_v21 = vpop.xlane.xlu0 %1563  ;;  %v1566_v22 = vpop.xlane.xlu1 %1565 }
 0x46e   : > { %2679 = vpow2.f32 %v1655_v27  ;;  %v3731_v23 = vsub.f32 %v3554_v35, %v1564_v21  ;;  %v3734_v24 = vsub.f32 %v3558_v44, %v1566_v22 }
 0x46f   : > { %2681 = vpow2.f32 %v1657_v28 }
 0x470   : > { %v2672_v31 = vpop.eup %2671  ;;  %v1659_v41 = vmul.f32 1.442695, %v3731_v23  ;;  %v1661_v32 = vmul.f32 1.442695, %v3734_v24 }
 0x471   : > { %1711 = vadd.xlane.f32.xlu0 %v2672_v31  ;;  %v1568_v40 = vpop.xlane.xlu0 %1567  ;;  %v1570_v33 = vpop.xlane.xlu1 %1569 }
 0x472   : > { %v2674_v42 = vpop.eup %2673  ;;  %2683 = vpow2.f32 %v1659_v41  ;;  %v3739_v45 = vsub.f32 %v3566_v47, %v1568_v40  ;;  %v3742_v35 = vsub.f32 %v3570_v38, %v1570_v33 }
 0x473   : > { %2685 = vpow2.f32 %v1661_v32 }
 0x474   : > { %v2676_v36 = vpop.eup %2675  ;;  %v1663_v44 = vmul.f32 1.442695, %v3739_v45  ;;  %v1665_v46 = vmul.f32 1.442695, %v3742_v35 }
 0x475   : > { %1715 = vadd.xlane.f32.xlu0 %v2674_v42  ;;  %1713 = vadd.xlane.f32.xlu1 %v2676_v36  ;;  %v1572_v37 = vpop.xlane.xlu0 %1571  ;;  %v1574_v39 = vpop.xlane.xlu1 %1573 }
 0x476   : > { %v2678_v49 = vpop.eup %2677  ;;  %2687 = vpow2.f32 %v1663_v44  ;;  %v3747_v52 = vsub.f32 %v3578_v50, %v1572_v37  ;;  %v3750_v47 = vsub.f32 %v3582_v51, %v1574_v39 }
 0x477   : > { %2689 = vpow2.f32 %v1665_v46 }
 0x478   : > { %v2680_v38 = vpop.eup %2679  ;;  %v1667_v53 = vmul.f32 1.442695, %v3747_v52  ;;  %v1669_v58 = vmul.f32 1.442695, %v3750_v47 }
 0x479   : > { %1717 = vadd.xlane.f32.xlu1 %v2678_v49  ;;  %1719 = vadd.xlane.f32.xlu0 %v2680_v38  ;;  %v1576_v59 = vpop.xlane.xlu0 %1575  ;;  %v1578_v1 = vpop.xlane.xlu1 %1577 }
 0x47a   : > { %v2682_v2 = vpop.eup %2681  ;;  %2691 = vpow2.f32 %v1667_v53  ;;  %v3755_v4 = vsub.f32 %v3590_v56, %v1576_v59  ;;  %v3758_v50 = vsub.f32 %v3594_v57, %v1578_v1 }
 0x47b   : > { %2693 = vpow2.f32 %v1669_v58 }
 0x47c   : > { %v2684_v51 = vpop.eup %2683  ;;  %v1671_v7 = vmul.f32 1.442695, %v3755_v4  ;;  %v1673_v8 = vmul.f32 1.442695, %v3758_v50 }
 0x47d   : > { %1721 = vadd.xlane.f32.xlu1 %v2682_v2  ;;  %1723 = vadd.xlane.f32.xlu0 %v2684_v51  ;;  %v1580_v20 = vpop.xlane.xlu0 %1579  ;;  %v1582_v25 = vpop.xlane.xlu1 %1581 }
 0x47e   : > { %v2686_v14 = vpop.eup %2685  ;;  %2695 = vpow2.f32 %v1671_v7  ;;  %v3763_v26 = vsub.f32 %v3602_v63, %v1580_v20  ;;  %v3766_v56 = vsub.f32 %v3606_v0, %v1582_v25 }
 0x47f   : > { %2697 = vpow2.f32 %v1673_v8 }
 0x480   : > { %v2688_v57 = vpop.eup %2687  ;;  %v1675_v15 = vmul.f32 1.442695, %v3763_v26  ;;  %v1677_v27 = vmul.f32 1.442695, %v3766_v56 }
 0x481   : > { %1725 = vadd.xlane.f32.xlu1 %v2686_v14  ;;  %1727 = vadd.xlane.f32.xlu0 %v2688_v57  ;;  %v1584_v28 = vpop.xlane.xlu0 %1583  ;;  %v1586_v21 = vpop.xlane.xlu1 %1585 }
 0x482   : > { %v2690_v22 = vpop.eup %2689  ;;  %2699 = vpow2.f32 %v1675_v15  ;;  %v3771_v31 = vsub.f32 %v3614_v5, %v1584_v28  ;;  %v3774_v63 = vsub.f32 %v3618_v6, %v1586_v21 }
 0x483   : > { %2701 = vpow2.f32 %v1677_v27 }
 0x484   : > { %v2692_v0 = vpop.eup %2691  ;;  %v1679_v41 = vmul.f32 1.442695, %v3771_v31  ;;  %v1681_v32 = vmul.f32 1.442695, %v3774_v63 }
 0x485   : > { %1729 = vadd.xlane.f32.xlu1 %v2690_v22  ;;  %1731 = vadd.xlane.f32.xlu0 %v2692_v0  ;;  %v1588_v40 = vpop.xlane.xlu0 %1587  ;;  %v1590_v33 = vpop.xlane.xlu1 %1589 }
 0x486   : > { %v2694_v42 = vpop.eup %2693  ;;  %2703 = vpow2.f32 %v1679_v41  ;;  %v3779_v36 = vsub.f32 %v3626_v11, %v1588_v40  ;;  %v3782_v5 = vsub.f32 %v3630_v12, %v1590_v33 }
 0x487   : > { %2705 = vpow2.f32 %v1681_v32 }
 0x488   : > { %v2696_v6 = vpop.eup %2695  ;;  %v1683_v44 = vmul.f32 1.442695, %v3779_v36  ;;  %v1685_v46 = vmul.f32 1.442695, %v3782_v5 }
 0x489   : > { %1733 = vadd.xlane.f32.xlu1 %v2694_v42  ;;  %1735 = vadd.xlane.f32.xlu0 %v2696_v6  ;;  %v1592_v37 = vpop.xlane.xlu0 %1591  ;;  %v1594_v39 = vpop.xlane.xlu1 %1593 }
 0x48a   : > { %v2698_v49 = vpop.eup %2697  ;;  %2707 = vpow2.f32 %v1683_v44  ;;  %v3787_v38 = vsub.f32 %v3638_v18, %v1592_v37  ;;  %v3790_v11 = vsub.f32 %v3642_v19, %v1594_v39 }
 0x48b   : > { %2709 = vpow2.f32 %v1685_v46 }
 0x48c   : > { %v2700_v12 = vpop.eup %2699  ;;  %v1687_v53 = vmul.f32 1.442695, %v3787_v38  ;;  %v1689_v58 = vmul.f32 1.442695, %v3790_v11 }
 0x48d   : > { %1737 = vadd.xlane.f32.xlu1 %v2698_v49  ;;  %1739 = vadd.xlane.f32.xlu0 %v2700_v12  ;;  %v1596_v59 = vpop.xlane.xlu0 %1595  ;;  %v1598_v1 = vpop.xlane.xlu1 %1597 }
 0x48e   : > { %v2702_v2 = vpop.eup %2701  ;;  %2711 = vpow2.f32 %v1687_v53  ;;  %v3795_v51 = vsub.f32 %v3650_v29, %v1596_v59  ;;  %v3798_v18 = vsub.f32 %v3654_v30, %v1598_v1 }
 0x48f   : > { %2713 = vpow2.f32 %v1689_v58 }
 0x490   : > { %v2704_v19 = vpop.eup %2703  ;;  %v1691_v7 = vmul.f32 1.442695, %v3795_v51  ;;  %v1693_v8 = vmul.f32 1.442695, %v3798_v18 }
 0x491   : > { %1741 = vadd.xlane.f32.xlu1 %v2702_v2  ;;  %1743 = vadd.xlane.f32.xlu0 %v2704_v19  ;;  %v1600_v20 = vpop.xlane.xlu0 %1599  ;;  %v1602_v25 = vpop.xlane.xlu1 %1601 }
 0x492   : > { %v2706_v14 = vpop.eup %2705  ;;  %2715 = vpow2.f32 %v1691_v7  ;;  %v3803_v57 = vsub.f32 %v3662_v43, %v1600_v20  ;;  %v3806_v29 = vsub.f32 %v3666_v34, %v1602_v25 }
 0x493   : > { %2717 = vpow2.f32 %v1693_v8 }
 0x494   : > { %v2708_v30 = vpop.eup %2707  ;;  %v1695_v15 = vmul.f32 1.442695, %v3803_v57  ;;  %v1697_v27 = vmul.f32 1.442695, %v3806_v29 }
 0x495   : > { %1745 = vadd.xlane.f32.xlu1 %v2706_v14  ;;  %1747 = vadd.xlane.f32.xlu0 %v2708_v30  ;;  %v1604_v28 = vpop.xlane.xlu0 %1603  ;;  %v1606_v21 = vpop.xlane.xlu1 %1605 }
 0x496   : > { %v2710_v22 = vpop.eup %2709  ;;  %2719 = vpow2.f32 %v1695_v15  ;;  %v3811_v0 = vsub.f32 %v3674_v48, %v1604_v28  ;;  %v3814_v43 = vsub.f32 %v3678_v61, %v1606_v21 }
 0x497   : > { %2721 = vpow2.f32 %v1697_v27 }
 0x498   : > { %v2712_v34 = vpop.eup %2711  ;;  %v1699_v41 = vmul.f32 1.442695, %v3811_v0  ;;  %v1701_v32 = vmul.f32 1.442695, %v3814_v43 }
 0x499   : > { %1749 = vadd.xlane.f32.xlu1 %v2710_v22  ;;  %1751 = vadd.xlane.f32.xlu0 %v2712_v34  ;;  %v1608_v40 = vpop.xlane.xlu0 %1607  ;;  %v1610_v33 = vpop.xlane.xlu1 %1609 }
 0x49a   : > { %v2714_v42 = vpop.eup %2713  ;;  %2723 = vpow2.f32 %v1699_v41  ;;  %v3819_v6 = vsub.f32 %v3686_v54, %v1608_v40  ;;  %v3822_v48 = vsub.f32 %v3690_v55, %v1610_v33 }
 0x49b   : > { %2725 = vpow2.f32 %v1701_v32 }
 0x49c   : > { %v2716_v61 = vpop.eup %2715  ;;  %v1703_v44 = vmul.f32 1.442695, %v3819_v6  ;;  %v1705_v46 = vmul.f32 1.442695, %v3822_v48 }
 0x49d   : > { %1753 = vadd.xlane.f32.xlu1 %v2714_v42  ;;  %1755 = vadd.xlane.f32.xlu0 %v2716_v61  ;;  %v1612_v37 = vpop.xlane.xlu0 %1611  ;;  %v1614_v39 = vpop.xlane.xlu1 %1613 }
 0x49e   : > { %v2718_v49 = vpop.eup %2717  ;;  %2727 = vpow2.f32 %v1703_v44  ;;  %v3827_v12 = vsub.f32 %v3698_v60, %v1612_v37  ;;  %v3830_v54 = vsub.f32 %v3702_v62, %v1614_v39 }
 0x49f   : > { %2729 = vpow2.f32 %v1705_v46 }
 0x4a0   : > { %v2720_v55 = vpop.eup %2719  ;;  %v1707_v53 = vmul.f32 1.442695, %v3827_v12  ;;  %v1709_v58 = vmul.f32 1.442695, %v3830_v54 }
 0x4a1   : > { %1757 = vadd.xlane.f32.xlu1 %v2718_v49  ;;  %1759 = vadd.xlane.f32.xlu0 %v2720_v55  ;;  %v2722_v59 = vpop.eup %2721 }
 0x4a2   : > { %2731 = vpow2.f32 %v1707_v53 }
 0x4a3   : > { %2733 = vpow2.f32 %v1709_v58 }
 0x4a4   : > { %v2724_v1 = vpop.eup %2723 }
 0x4a5   : > { %1761 = vadd.xlane.f32.xlu1 %v2722_v59  ;;  %1763 = vadd.xlane.f32.xlu0 %v2724_v1  ;;  %v2726_v2 = vpop.eup %2725 }
 0x4a8   : > { %v2728_v60 = vpop.eup %2727 }
 0x4a9   : > { %1765 = vadd.xlane.f32.xlu1 %v2726_v2  ;;  %1767 = vadd.xlane.f32.xlu0 %v2728_v60  ;;  %v2730_v62 = vpop.eup %2729 }
 0x4ac   : > { %v2732_v19 = vpop.eup %2731 }
 0x4ad   : > { %1769 = vadd.xlane.f32.xlu1 %v2730_v62  ;;  %1771 = vadd.xlane.f32.xlu0 %v2732_v19  ;;  %v2734_v7 = vpop.eup %2733 }
 0x4b1   : > { %1773 = vadd.xlane.f32.xlu1 %v2734_v7 }
 0x4fe   : > { %v1712_v8 = vpop.xlane.xlu0 %1711 }
 0x4ff   : > { %2735 = vlog2.f32 %v1712_v8 }
 0x502   : > { %v1714_v20 = vpop.xlane.xlu1 %1713  ;;  %v1716_v25 = vpop.xlane.xlu0 %1715 }
 0x503   : > { %2737 = vlog2.f32 %v1714_v20 }
 0x504   : > { %2739 = vlog2.f32 %v1716_v25 }
 0x506   : > { %v1718_v14 = vpop.xlane.xlu1 %1717  ;;  %v1720_v30 = vpop.xlane.xlu0 %1719 }
 0x507   : > { %2741 = vlog2.f32 %v1718_v14 }
 0x508   : > { %2743 = vlog2.f32 %v1720_v30 }
 0x509   : > { %v2736_v15 = vpop.eup %2735 }
 0x50a   : > { %v1776_v27 = vmul.f32 0.6931472, %v2736_v15  ;;  %v1722_v28 = vpop.xlane.xlu1 %1721  ;;  %v1724_v21 = vpop.xlane.xlu0 %1723 }
 0x50b   : > { %2745 = vlog2.f32 %v1722_v28 }
 0x50c   : > { %v1839_v22 = vsub.f32 %v3707_v13, %v1776_v27  ;;  %2747 = vlog2.f32 %v1724_v21 }
 0x50d   : > { %v2738_v34 = vpop.eup %2737 }
 0x50e   : > { %v2740_v41 = vpop.eup %2739  ;;  %1871 = vst [vmem:[#allocation12] sm:$0xff] %v1839_v22  ;;  %v1778_v32 = vmul.f32 0.6931472, %v2738_v34  ;;  %v1726_v40 = vpop.xlane.xlu1 %1725 }
 0x50f   : > { %v1728_v33 = vpop.xlane.xlu0 %1727  ;;  %v1780_v42 = vmul.f32 0.6931472, %v2740_v41  ;;  %2749 = vlog2.f32 %v1726_v40 }
 0x510   : > { %v1840_v61 = vsub.f32 %v3715_v9, %v1778_v32  ;;  %2751 = vlog2.f32 %v1728_v33 }
 0x511   : > { %v2742_v44 = vpop.eup %2741  ;;  %v1841_v46 = vsub.f32 %v3710_v3, %v1780_v42 }
 0x512   : > { %v2744_v37 = vpop.eup %2743  ;;  %1872 = vst [vmem:[#allocation12 + $0x8] sm:$0xff] %v1840_v61  ;;  %v1782_v39 = vmul.f32 0.6931472, %v2742_v44  ;;  %v1730_v49 = vpop.xlane.xlu1 %1729 }
 0x513   : > { %v1732_v13 = vpop.xlane.xlu0 %1731  ;;  %1873 = vst [vmem:[#allocation12 + $0x10] sm:$0xff] %v1841_v46  ;;  %v1784_v55 = vmul.f32 0.6931472, %v2744_v37  ;;  %2753 = vlog2.f32 %v1730_v49 }
 0x514   : > { %v1842_v53 = vsub.f32 %v3718_v10, %v1782_v39  ;;  %2755 = vlog2.f32 %v1732_v13 }
 0x515   : > { %v2746_v58 = vpop.eup %2745  ;;  %v1843_v59 = vsub.f32 %v3723_v16, %v1784_v55 }
 0x516   : > { %v2748_v1 = vpop.eup %2747  ;;  %1874 = vst [vmem:[#allocation12 + $0x18] sm:$0xff] %v1842_v53  ;;  %v1786_v9 = vmul.f32 0.6931472, %v2746_v58  ;;  %v1734_v2 = vpop.xlane.xlu1 %1733 }
 0x517   : > { %v1736_v60 = vpop.xlane.xlu0 %1735  ;;  %1875 = vst [vmem:[#allocation12 + $0x20] sm:$0xff] %v1843_v59  ;;  %v1788_v3 = vmul.f32 0.6931472, %v2748_v1  ;;  %2757 = vlog2.f32 %v1734_v2 }
 0x518   : > { %v1844_v62 = vsub.f32 %v3726_v17, %v1786_v9  ;;  %2759 = vlog2.f32 %v1736_v60 }
 0x519   : > { %v2750_v19 = vpop.eup %2749  ;;  %v1845_v7 = vsub.f32 %v3731_v23, %v1788_v3 }
 0x51a   : > { %v2752_v8 = vpop.eup %2751  ;;  %1876 = vst [vmem:[#allocation12 + $0x28] sm:$0xff] %v1844_v62  ;;  %v1790_v10 = vmul.f32 0.6931472, %v2750_v19  ;;  %v1738_v20 = vpop.xlane.xlu1 %1737 }
 0x51b   : > { %v1740_v25 = vpop.xlane.xlu0 %1739  ;;  %1877 = vst [vmem:[#allocation12 + $0x30] sm:$0xff] %v1845_v7  ;;  %v1792_v16 = vmul.f32 0.6931472, %v2752_v8  ;;  %2761 = vlog2.f32 %v1738_v20 }
 0x51c   : > { %v1846_v14 = vsub.f32 %v3734_v24, %v1790_v10  ;;  %2763 = vlog2.f32 %v1740_v25 }
 0x51d   : > { %v2754_v30 = vpop.eup %2753  ;;  %v1847_v15 = vsub.f32 %v3739_v45, %v1792_v16 }
 0x51e   : > { %v2756_v27 = vpop.eup %2755  ;;  %1878 = vst [vmem:[#allocation12 + $0x38] sm:$0xff] %v1846_v14  ;;  %v1794_v17 = vmul.f32 0.6931472, %v2754_v30  ;;  %v1742_v28 = vpop.xlane.xlu1 %1741 }
 0x51f   : > { %v1744_v21 = vpop.xlane.xlu0 %1743  ;;  %1879 = vst [vmem:[#allocation12 + $0x40] sm:$0xff] %v1847_v15  ;;  %v1796_v23 = vmul.f32 0.6931472, %v2756_v27  ;;  %2765 = vlog2.f32 %v1742_v28 }
 0x520   : > { %v1848_v22 = vsub.f32 %v3742_v35, %v1794_v17  ;;  %2767 = vlog2.f32 %v1744_v21 }
 0x521   : > { %v2758_v34 = vpop.eup %2757  ;;  %v1849_v41 = vsub.f32 %v3747_v52, %v1796_v23 }
 0x522   : > { %v2760_v32 = vpop.eup %2759  ;;  %1880 = vst [vmem:[#allocation12 + $0x48] sm:$0xff] %v1848_v22  ;;  %v1798_v24 = vmul.f32 0.6931472, %v2758_v34  ;;  %v1746_v40 = vpop.xlane.xlu1 %1745 }
 0x523   : > { %v1748_v33 = vpop.xlane.xlu0 %1747  ;;  %1881 = vst [vmem:[#allocation12 + $0x50] sm:$0xff] %v1849_v41  ;;  %v1800_v45 = vmul.f32 0.6931472, %v2760_v32  ;;  %2769 = vlog2.f32 %v1746_v40 }
 0x524   : > { %v1850_v42 = vsub.f32 %v3750_v47, %v1798_v24  ;;  %2771 = vlog2.f32 %v1748_v33 }
 0x525   : > { %v2762_v61 = vpop.eup %2761  ;;  %v1851_v44 = vsub.f32 %v3755_v4, %v1800_v45 }
 0x526   : > { %v2764_v46 = vpop.eup %2763  ;;  %1882 = vst [vmem:[#allocation12 + $0x58] sm:$0xff] %v1850_v42  ;;  %v1802_v35 = vmul.f32 0.6931472, %v2762_v61  ;;  %v1750_v37 = vpop.xlane.xlu1 %1749 }
 0x527   : > { %v1752_v39 = vpop.xlane.xlu0 %1751  ;;  %1883 = vst [vmem:[#allocation12 + $0x60] sm:$0xff] %v1851_v44  ;;  %v1804_v52 = vmul.f32 0.6931472, %v2764_v46  ;;  %2773 = vlog2.f32 %v1750_v37 }
 0x528   : > { %v1852_v49 = vsub.f32 %v3758_v50, %v1802_v35  ;;  %2775 = vlog2.f32 %v1752_v39 }
 0x529   : > { %v2766_v13 = vpop.eup %2765  ;;  %v1853_v55 = vsub.f32 %v3763_v26, %v1804_v52 }
 0x52a   : > { %v2768_v53 = vpop.eup %2767  ;;  %1884 = vst [vmem:[#allocation12 + $0x68] sm:$0xff] %v1852_v49  ;;  %v1806_v47 = vmul.f32 0.6931472, %v2766_v13  ;;  %v1754_v58 = vpop.xlane.xlu1 %1753 }
 0x52b   : > { %v1756_v59 = vpop.xlane.xlu0 %1755  ;;  %1885 = vst [vmem:[#allocation12 + $0x70] sm:$0xff] %v1853_v55  ;;  %v1808_v4 = vmul.f32 0.6931472, %v2768_v53  ;;  %2777 = vlog2.f32 %v1754_v58 }
 0x52c   : > { %v1854_v1 = vsub.f32 %v3766_v56, %v1806_v47  ;;  %2779 = vlog2.f32 %v1756_v59 }
 0x52d   : > { %v2770_v9 = vpop.eup %2769  ;;  %v1855_v2 = vsub.f32 %v3771_v31, %v1808_v4 }
 0x52e   : > { %v2772_v60 = vpop.eup %2771  ;;  %1886 = vst [vmem:[#allocation12 + $0x78] sm:$0xff] %v1854_v1  ;;  %v1810_v50 = vmul.f32 0.6931472, %v2770_v9  ;;  %v1758_v3 = vpop.xlane.xlu1 %1757 }
 0x52f   : > { %v1760_v62 = vpop.xlane.xlu0 %1759  ;;  %1887 = vst [vmem:[#allocation12 + $0x80] sm:$0xff] %v1855_v2  ;;  %v1812_v26 = vmul.f32 0.6931472, %v2772_v60  ;;  %2781 = vlog2.f32 %v1758_v3 }
 0x530   : > { %v1856_v19 = vsub.f32 %v3774_v63, %v1810_v50  ;;  %2783 = vlog2.f32 %v1760_v62 }
 0x531   : > { %v2774_v7 = vpop.eup %2773  ;;  %v1857_v8 = vsub.f32 %v3779_v36, %v1812_v26 }
 0x532   : > { %v2776_v10 = vpop.eup %2775  ;;  %1888 = vst [vmem:[#allocation12 + $0x88] sm:$0xff] %v1856_v19  ;;  %v1814_v56 = vmul.f32 0.6931472, %v2774_v7  ;;  %v1762_v20 = vpop.xlane.xlu1 %1761 }
 0x533   : > { %v1764_v25 = vpop.xlane.xlu0 %1763  ;;  %1889 = vst [vmem:[#allocation12 + $0x90] sm:$0xff] %v1857_v8  ;;  %v1816_v31 = vmul.f32 0.6931472, %v2776_v10  ;;  %2785 = vlog2.f32 %v1762_v20 }
 0x534   : > { %v1858_v16 = vsub.f32 %v3782_v5, %v1814_v56  ;;  %2787 = vlog2.f32 %v1764_v25 }
 0x535   : > { %v2778_v14 = vpop.eup %2777  ;;  %v1859_v30 = vsub.f32 %v3787_v38, %v1816_v31 }
 0x536   : > { %v2780_v15 = vpop.eup %2779  ;;  %1890 = vst [vmem:[#allocation12 + $0x98] sm:$0xff] %v1858_v16  ;;  %v1818_v63 = vmul.f32 0.6931472, %v2778_v14  ;;  %v1766_v27 = vpop.xlane.xlu1 %1765 }
 0x537   : > { %v1768_v17 = vpop.xlane.xlu0 %1767  ;;  %1891 = vst [vmem:[#allocation12 + $0xa0] sm:$0xff] %v1859_v30  ;;  %v1820_v36 = vmul.f32 0.6931472, %v2780_v15  ;;  %2789 = vlog2.f32 %v1766_v27 }
 0x538   : > { %v1860_v28 = vsub.f32 %v3790_v11, %v1818_v63  ;;  %2791 = vlog2.f32 %v1768_v17 }
 0x539   : > { %v2782_v21 = vpop.eup %2781  ;;  %v1861_v23 = vsub.f32 %v3795_v51, %v1820_v36 }
 0x53a   : > { %v2784_v22 = vpop.eup %2783  ;;  %1892 = vst [vmem:[#allocation12 + $0xa8] sm:$0xff] %v1860_v28  ;;  %v1822_v5 = vmul.f32 0.6931472, %v2782_v21  ;;  %v1770_v34 = vpop.xlane.xlu1 %1769 }
 0x53b   : > { %v1772_v41 = vpop.xlane.xlu0 %1771  ;;  %1893 = vst [vmem:[#allocation12 + $0xb0] sm:$0xff] %v1861_v23  ;;  %v1824_v38 = vmul.f32 0.6931472, %v2784_v22  ;;  %2793 = vlog2.f32 %v1770_v34 }
 0x53c   : > { %v1862_v32 = vsub.f32 %v3798_v18, %v1822_v5  ;;  %2795 = vlog2.f32 %v1772_v41 }
 0x53d   : > { %v2786_v24 = vpop.eup %2785  ;;  %v1863_v40 = vsub.f32 %v3803_v57, %v1824_v38 }
 0x53e   : > { %v2788_v33 = vpop.eup %2787  ;;  %1894 = vst [vmem:[#allocation12 + $0xb8] sm:$0xff] %v1862_v32  ;;  %v1826_v11 = vmul.f32 0.6931472, %v2786_v24  ;;  %v1774_v45 = vpop.xlane.xlu1 %1773 }
 0x53f   : > { %1895 = vst [vmem:[#allocation12 + $0xc0] sm:$0xff] %v1863_v40  ;;  %v1828_v51 = vmul.f32 0.6931472, %v2788_v33  ;;  %2797 = vlog2.f32 %v1774_v45 }
 0x540   : > { %v1864_v42 = vsub.f32 %v3806_v29, %v1826_v11 }
 0x541   : > { %v2790_v61 = vpop.eup %2789  ;;  %v1865_v44 = vsub.f32 %v3811_v0, %v1828_v51 }
 0x542   : > { %v2792_v46 = vpop.eup %2791  ;;  %1896 = vst [vmem:[#allocation12 + $0xc8] sm:$0xff] %v1864_v42  ;;  %v1830_v35 = vmul.f32 0.6931472, %v2790_v61 }
 0x543   : > { %1897 = vst [vmem:[#allocation12 + $0xd0] sm:$0xff] %v1865_v44  ;;  %v1832_v18 = vmul.f32 0.6931472, %v2792_v46 }
 0x544   : > { %v1866_v37 = vsub.f32 %v3814_v43, %v1830_v35 }
 0x545   : > { %v2794_v57 = vpop.eup %2793  ;;  %v1867_v39 = vsub.f32 %v3819_v6, %v1832_v18 }
 0x546   : > { %v2796_v52 = vpop.eup %2795  ;;  %1898 = vst [vmem:[#allocation12 + $0xd8] sm:$0xff] %v1866_v37  ;;  %v1834_v49 = vmul.f32 0.6931472, %v2794_v57 }
 0x547   : > { %1899 = vst [vmem:[#allocation12 + $0xe0] sm:$0xff] %v1867_v39  ;;  %v1836_v13 = vmul.f32 0.6931472, %v2796_v52 }
 0x548   : > { %v1868_v29 = vsub.f32 %v3822_v48, %v1834_v49 }
 0x549   : > { %v2798_v55 = vpop.eup %2797  ;;  %v1869_v0 = vsub.f32 %v3827_v12, %v1836_v13 }
 0x54a   : > { %1900 = vst [vmem:[#allocation12 + $0xe8] sm:$0xff] %v1868_v29  ;;  %v1838_v53 = vmul.f32 0.6931472, %v2798_v55 }
 0x54b   : > { %1901 = vst [vmem:[#allocation12 + $0xf0] sm:$0xff] %v1869_v0 }
 0x54c   : > { %v1870_v47 = vsub.f32 %v3830_v54, %v1838_v53 }
 0x54e   : > { %1902 = vst [vmem:[#allocation12 + $0xf8] sm:$0xff] %v1870_v47 }
 0x54f PF: > { %s3955_s25 = sld [smem:[#allocation18_spill]]  ;;  %s3028_s17 = smov [#allocation12]  }
 0x550   : > { %s1909_s12 = sshll.u32 %s3028_s17, 4  ;;  %s1910_s12 = int_to_ptr.vmem [resolvable:$true] %s1909_s12 }
 0x551   : > { %s2913_s21 = scalar_lea.vmem %s1910_s12, 4096  ;;  %p2920_p12 = scmp.lt.s32.totalorder %s1910_s12, %s1910_s12 }
 0x552   : > { %p2914_p13 = scmp.ne.s32.totalorder %s1910_s12, %s2913_s21  ;;  %p2921_p1 = scmp.lt.s32.totalorder %s2913_s21, %s2913_s21 }
 0x554   : > { %p2922_p8 = por %p2921_p1, %p2920_p12 }
 0x555   : > { %s3956_s29 = sadd.s32 4294967295, %s3955_s25  }
 0x556   : > { %p3868_p10 = scmp.eq.s32.totalorder %s3956_s29, 3 }
 0x558   : > { %p2915_p2 = pnand %p2914_p13, %p3868_p10 }
 0x55a   : > { %p2916_p4 = pneg %p2915_p2 }
 0x55c   : > { %p2923_p5 = pnand %p2922_p8, %p2916_p4 }
 0x55e   : > { %2926 = shalt.err (!%p2923_p5)
}
 0x55f   : > { %s3958_s8 = sld [smem:[#allocation21_spill]] }
 0x565   : > { %s2927_s30 = scalar_lea.hbm %s3958_s8, 4096 }
 0x566   : > { %p2928_p6 = scmp.ne.s32.totalorder %s3958_s8, %s2927_s30  ;;  %p2933_p0 = scmp.lt.u32.totalorder %s2927_s30, %s3958_s8 }
 0x568   : > { %p2929_p9 = pnand %p2928_p6, %p3868_p10 }
 0x56a   : > { %p2930_p11 = pneg %p2929_p9 }
 0x56c   : > { %p2935_p3 = pnand %p2933_p0, %p2930_p11 }
 0x56e   : > { %2938 = shalt.err (!%p2935_p3)
}
 0x56f   : > { %s3029_s2 = smov 128   ;;  %s3030_s4 = smov 8  }
 0x570   : > { %2570 = dma.vmem_to_hbm [thread:$0]  (%p3868_p10), %s1910_s12, 4096, %s3958_s8, [#allocation6], %s3029_s2, %s3029_s2, %s3030_s4  }
 0x571   : > { %2984 = dma.done.wait (%p3868_p10), [#allocation6], 4096  }
 0x572   : > { %2986 = vsyncadd (%p3868_p10), [#allocation6], 4294963200 }
 0x573 PF: > { %s3959_s11 = sld [smem:[#allocation18_spill]]  ;;  %s3960_s21 = smov %s2993_s22 }
 0x574   : > { %s3961_s22 = smov %s2997_s23  ;;  %s3962_s23 = smov %s3222_s28 }
 0x575   : > { %s3963_s24 = smov %s3009_s26  ;;  %s3964_s25 = smov %s3013_s27 }
 0x576   : > { %s3965_s26 = smov %s3969_s18  ;;  %s3966_s27 = smov %s3973_s10 }
 0x579   : > { %s22_s6 = sadd.s32 1, %s3959_s11  }
 0x57a   : > { %p19_p7 = scmp.ge.s32.totalorder %s22_s6, 6   ;;  %s3967_s28 = smov %s22_s6 }
 0x57c   :  { %21 = sbr.rel (!%p19_p7) target bundleno = 12 (0xc), region = 107 }
 0x583   :  { %1925 = vsyncpa [#allocation5], 1 }
 0x584   :  { %1927 = vsyncpa [#allocation5 + $0x1], 1 }
 0x585   :  { %1928 = vsyncpa [#allocation8], 1 }
 0x586   :  { %1929 = vsyncpa [#allocation11], 1 }
 0x587   :  { %1931 = vsyncpa [#allocation11 + $0x1], 1 }
 0x588   :  { %1932 = vsyncpa [#allocation6], 1 }
 0x589   :  { %1934 = vsyncpa [#allocation6 + $0x1], 1 }

</bundles_post_ra>
